<compile_context>
chip_gen: v5e
topology: v5e:2x2
jax: 0.10.0
libtpu: 0.0.40
codegen_flags: <defaults>
</compile_context>

<pallas_src>
import functools

import numpy as np
import jax
import jax.numpy as jnp
from jax import lax
from jax.experimental import pallas as pl
from jax.experimental.pallas import tpu as pltpu

BN_EPS = 1e-5


# ---------- bilinear (align_corners=True) interpolation weights --------------

def _interp_matrix(n_out, n_in):
    a = np.zeros((n_out, n_in), dtype=np.float32)
    if n_out == 1 or n_in == 1:
        a[:, 0] = 1.0
        return a
    scale = (n_in - 1) / (n_out - 1)
    for j in range(n_out):
        src = j * scale
        lo = int(np.floor(src))
        hi = min(lo + 1, n_in - 1)
        frac = src - lo
        a[j, lo] += 1.0 - frac
        a[j, hi] += frac
    return a


# ---------- fused Up kernel ---------------------------------------------------

def _up_double_conv_kernel(
    x1s_ref, x2s_ref, ph_ref,           # activations + height-interp matrix
    band1_ref, band2_ref,               # banded conv weights (3K, Kout) bf16
    s1_ref, e1_ref, s2_ref, e2_ref,     # BN lane<->channel one-hot reduce/expand
    g1_ref, b1_ref, g2_ref, b2_ref,     # BN affine, (1, C)
    vm_ref,                             # (NRO, 1) valid-row mask
    o_ref,                              # (H, N*Cout*W) lane-dense output
    a_scr, b_scr, st1_scr, st2_scr,     # VMEM scratch
    *, N, H, H1, HR, NRO, C2W, inv_count,
):
    f32 = jnp.float32
    kin = a_scr.shape[1]
    kout = o_ref.shape[1] // N
    vm = vm_ref[...]

    # ---- conv1 input stage: zero pad rows + direct sliced writes ------------
    a_scr[...] = jnp.zeros_like(a_scr)
    for n in range(N):
        r0 = 1 + n * HR
        # skip connection x2 -> low channel block (torch.cat([x2, x1], dim=1))
        a_scr[r0:r0 + H, 0:C2W] = x2s_ref[n * H:(n + 1) * H, :]
        # x1: bilinear height interp (align_corners=True) + vertical F.pad
        # offset; width interp + horizontal pad are folded into band1.
        a_scr[r0:r0 + H, C2W:kin] = jnp.dot(
            ph_ref[...], x1s_ref[n * H1:(n + 1) * H1, :],
            preferred_element_type=f32)

    def conv_bn_relu(src_ref, stage_ref, band_ref, s_ref, e_ref, g_ref, b_ref):
        k = src_ref.shape[1]
        # cast to bf16 once, then three sublane-shifted slices -> (NRO, 3K)
        src = src_ref[...].astype(jnp.bfloat16)
        for dy in range(3):
            stage_ref[:, dy * k:(dy + 1) * k] = src[dy:dy + NRO, :]
        # one big-K MXU matmul per conv layer (f32 accumulation)
        acc = jnp.dot(stage_ref[...], band_ref[...], preferred_element_type=f32)

        # BatchNorm2d, training mode (biased batch variance) — one-pass stats.
        vmb = jnp.broadcast_to(vm, acc.shape)          # hoisted, reused twice
        accm = acc * vmb
        msum = jnp.sum(accm, axis=0, keepdims=True)            # (1, K)
        sqsum = jnp.sum(accm * acc, axis=0, keepdims=True)     # (1, K)
        mean_c = jnp.dot(msum, s_ref[...], preferred_element_type=f32) * inv_count
        ex2_c = jnp.dot(sqsum, s_ref[...], preferred_element_type=f32) * inv_count
        var_c = ex2_c - mean_c * mean_c
        scale_c = g_ref[...] * lax.rsqrt(var_c + BN_EPS)       # (1, C)
        shift_c = b_ref[...] - mean_c * scale_c
        scale_l = jnp.dot(scale_c, e_ref[...], preferred_element_type=f32)
        shift_l = jnp.dot(shift_c, e_ref[...], preferred_element_type=f32)
        # ReLU; zero the inter-image pad / garbage rows
        return jnp.maximum(acc * scale_l + shift_l, 0.0) * vmb

    h1 = conv_bn_relu(a_scr, st1_scr, band1_ref, s1_ref, e1_ref, g1_ref, b1_ref)

    # conv2 input stage: re-insert the leading zero row, keep zeros elsewhere.
    b_scr[...] = jnp.zeros_like(b_scr)
    b_scr[1:1 + NRO, :] = h1
    h2 = conv_bn_relu(b_scr, st2_scr, band2_ref, s2_ref, e2_ref, g2_ref, b2_ref)

    # lane-dense output: valid rows of each image go into a 64-lane block of a
    # 128-lane output row, so the HBM writeback is unmasked / full-width.
    for n in range(N):
        o_ref[:, n * kout:(n + 1) * kout] = h2[n * HR:n * HR + H, :]


# ---------- host-side constant construction (done once) -----------------------

def build_up_consts(params, x1_shape, x2_shape):
    N, C1, H1, W1 = x1_shape
    N2, C2, H, W = x2_shape
    assert N2 == N
    w1 = np.asarray(params["w1"], np.float32)      # (Cmid, Cin, 3, 3)
    w2 = np.asarray(params["w2"], np.float32)      # (Cout, Cmid, 3, 3)
    Cmid, Cin = int(w1.shape[0]), int(w1.shape[1])
    Cout = int(w2.shape[0])
    assert Cin == C1 + C2 and int(w2.shape[1]) == Cmid

    H1u, W1u = 2 * H1, 2 * W1
    diffY, diffX = H - H1u, W - W1u
    assert diffY >= 0 and diffX >= 0, "upsampled x1 larger than x2 is unsupported"
    dY0, dX0 = diffY // 2, diffX // 2

    HR, NRO = H + 2, N * (H + 2)
    KMID, KOUT = Cmid * W, Cout * W
    C2W, C1W1 = C2 * W, C1 * W1
    KIN = C2W + C1W1

    # height / width interpolation with the F.pad placement offsets folded in
    ph = np.zeros((H, H1), np.float32)
    ph[dY0:dY0 + H1u, :] = _interp_matrix(H1u, H1)
    pwt = np.zeros((W1, W), np.float32)
    pwt[:, dX0:dX0 + W1u] = _interp_matrix(W1u, W1).T

    # dx-tap selector with horizontal 'same' padding folded in
    dsel = np.zeros((3, W, W), np.float32)
    for dx in range(3):
        for wo in range(W):
            wi = wo + dx - 1
            if 0 <= wi < W:
                dsel[dx, wi, wo] = 1.0

    # banded conv1 weights: x2 block at full W; x1 block at original W1 with
    # the bilinear width interpolation + horizontal pad folded in.
    band1_x2 = np.einsum('oiyx,xvw->yivow', w1[:, :C2], dsel).reshape(3, C2W, KMID)
    pwt_sel = np.einsum('uv,xvw->xuw', pwt, dsel)                    # (3, W1, W)
    band1_x1 = np.einsum('oiyx,xuw->yiuow', w1[:, C2:], pwt_sel).reshape(3, C1W1, KMID)
    band1 = np.concatenate([band1_x2, band1_x1], axis=1).reshape(3 * KIN, KMID)
    band2 = np.einsum('oiyx,xvw->yivow', w2, dsel).reshape(3 * KMID, KOUT)

    # BN lane<->channel one-hot reduce / expand (O(C^2*W), not O((C*W)^2))
    s1 = np.kron(np.eye(Cmid, dtype=np.float32), np.ones((W, 1), np.float32))
    s2 = np.kron(np.eye(Cout, dtype=np.float32), np.ones((W, 1), np.float32))

    vm = ((np.arange(NRO) % HR) < H).astype(np.float32).reshape(NRO, 1)

    return {
        "ph": jnp.asarray(ph),
        "band1": jnp.asarray(band1, jnp.bfloat16),
        "band2": jnp.asarray(band2, jnp.bfloat16),
        "s1": jnp.asarray(s1), "e1": jnp.asarray(s1.T.copy()),
        "s2": jnp.asarray(s2), "e2": jnp.asarray(s2.T.copy()),
        "g1": jnp.asarray(params["g1"], jnp.float32).reshape(1, Cmid),
        "b1": jnp.asarray(params["b1"], jnp.float32).reshape(1, Cmid),
        "g2": jnp.asarray(params["g2"], jnp.float32).reshape(1, Cout),
        "b2": jnp.asarray(params["b2"], jnp.float32).reshape(1, Cout),
        "vm": jnp.asarray(vm),
    }


@jax.jit
def up_forward(x1, x2, consts):
    """x1, x2 in NCHW; NCHW output of Up(in_ch, out_ch, bilinear=True) with
    BatchNorm in training mode (batch statistics, biased variance)."""
    N, C1, H1, W1 = x1.shape
    _, C2, H, W = x2.shape
    Cmid = consts["g1"].shape[1]
    Cout = consts["g2"].shape[1]
    KMID, KOUT = Cmid * W, Cout * W
    C2W, C1W1 = C2 * W, C1 * W1
    KIN = C2W + C1W1
    HR = H + 2
    NRO = N * HR
    NRB = ((NRO + 2 + 7) // 8) * 8
    inv_count = 1.0 / float(N * H * W)
    assert consts["band1"].shape == (3 * KIN, KMID)
    assert consts["band2"].shape == (3 * KMID, KOUT)

    # activation layout: rows = (image, image row), lanes = (channel * width)
    x1s = jnp.transpose(x1, (0, 2, 1, 3)).reshape(N * H1, C1W1)
    x2s = jnp.transpose(x2, (0, 2, 1, 3)).reshape(N * H, C2W)

    vmem = pl.BlockSpec(memory_space=pltpu.MemorySpace.VMEM)
    kernel = functools.partial(
        _up_double_conv_kernel,
        N=N, H=H, H1=H1, HR=HR, NRO=NRO, C2W=C2W, inv_count=inv_count)

    out2d = pl.pallas_call(
        kernel,
        out_shape=jax.ShapeDtypeStruct((H, N * KOUT), jnp.float32),
        in_specs=[vmem] * 14,
        out_specs=vmem,
        scratch_shapes=[
            pltpu.VMEM((NRB, KIN), jnp.float32),         # conv1 row buffer
            pltpu.VMEM((NRB, KMID), jnp.float32),        # conv2 row buffer
            pltpu.VMEM((NRO, 3 * KIN), jnp.bfloat16),    # conv1 im2col stage
            pltpu.VMEM((NRO, 3 * KMID), jnp.bfloat16),   # conv2 im2col stage
        ],
    )(x1s, x2s, consts["ph"], consts["band1"], consts["band2"],
      consts["s1"], consts["e1"], consts["s2"], consts["e2"],
      consts["g1"], consts["b1"], consts["g2"], consts["b2"], consts["vm"])

    out = out2d.reshape(H, N, Cout, W)                   # undo lane-dense layout
    return jnp.transpose(out, (1, 2, 0, 3))              # (N, Cout, H, W)


# ---------- parameters & pure-JAX reference -----------------------------------

def init_params(key, in_channels, out_channels):
    mid = in_channels // 2
    k1, k2, k3, k4, k5, k6 = jax.random.split(key, 6)
    w1 = jax.random.normal(k1, (mid, in_channels, 3, 3), jnp.float32) / np.sqrt(in_channels * 9)
    w2 = jax.random.normal(k2, (out_channels, mid, 3, 3), jnp.float32) / np.sqrt(mid * 9)
    g1 = 1.0 + 0.1 * jax.random.normal(k3, (mid,), jnp.float32)
    b1 = 0.1 * jax.random.normal(k4, (mid,), jnp.float32)
    g2 = 1.0 + 0.1 * jax.random.normal(k5, (out_channels,), jnp.float32)
    b2 = 0.1 * jax.random.normal(k6, (out_channels,), jnp.float32)
    return {"w1": w1, "w2": w2, "g1": g1, "b1": b1, "g2": g2, "b2": b2}


def reference_forward(x1, x2, w1_oihw, w2_oihw, g1, b1, g2, b2):
    N, C, H, W = x1.shape
    ah = jnp.asarray(_interp_matrix(2 * H, H))
    aw = jnp.asarray(_interp_matrix(2 * W, W))
    u = jnp.einsum('ph,nchw->ncpw', ah, x1)
    u = jnp.einsum('qw,ncpw->ncpq', aw, u)
    diffY = x2.shape[2] - u.shape[2]
    diffX = x2.shape[3] - u.shape[3]
    u = jnp.pad(u, ((0, 0), (0, 0),
                    (diffY // 2, diffY - diffY // 2),
                    (diffX // 2, diffX - diffX // 2)))
    x = jnp.concatenate([x2, u], axis=1)

    def conv_bn_relu(x, w, g, b):
        y = lax.conv_general_dilated(x, w, (1, 1), 'SAME',
                                     dimension_numbers=('NCHW', 'OIHW', 'NCHW'))
        mean = jnp.mean(y, axis=(0, 2, 3), keepdims=True)
        var = jnp.mean((y - mean) ** 2, axis=(0, 2, 3), keepdims=True)
        y = (y - mean) / jnp.sqrt(var + BN_EPS)
        y = y * g.reshape(1, -1, 1, 1) + b.reshape(1, -1, 1, 1)
        return jnp.maximum(y, 0.0)

    x = conv_bn_relu(x, w1_oihw, g1, b1)
    x = conv_bn_relu(x, w2_oihw, g2, b2)
    return x


if __name__ == "__main__":
    key = jax.random.PRNGKey(0)
    kx1, kx2, kp = jax.random.split(key, 3)

    # UNet Up(in_channels=8, out_channels=4, bilinear=True):
    # x1 (to be upsampled): 4 channels at 8x8; skip x2: 4 channels at 16x16.
    N, C1, H1, W1 = 2, 4, 8, 8
    C2, H2, W2 = 4, 16, 16
    in_channels, out_channels = C1 + C2, 4

    x1 = jax.random.normal(kx1, (N, C1, H1, W1), jnp.float32)
    x2 = jax.random.normal(kx2, (N, C2, H2, W2), jnp.float32)
    params = init_params(kp, in_channels, out_channels)

    consts = build_up_consts(params, x1.shape, x2.shape)     # built/uploaded once
    out = jax.block_until_ready(up_forward(x1, x2, consts))
    assert out.shape == (N, out_channels, H2, W2)

    ref = reference_forward(x1, x2, params["w1"], params["w2"],
                            params["g1"], params["b1"], params["g2"], params["b2"])
    err = float(jnp.max(jnp.abs(out - ref)))
    # Conv matmuls use bf16 operands (f32 accumulation, f32 BN statistics), so
    # a bf16-level tolerance is used against the pure-f32 reference.
    assert jnp.allclose(out, ref, rtol=5e-2, atol=5e-2), f"max abs err {err}"
    print("KERNEL_OK")
</pallas_src>

<mosaic_0001>
module attributes {stable_mosaic.version = 11 : i64} {
  func.func @_up_double_conv_kernel(%arg0: memref<16x32xf32, #tpu.memory_space<vmem>>, %arg1: memref<32x64xf32, #tpu.memory_space<vmem>>, %arg2: memref<16x8xf32, #tpu.memory_space<vmem>>, %arg3: memref<288x64xbf16, #tpu.memory_space<vmem>>, %arg4: memref<192x64xbf16, #tpu.memory_space<vmem>>, %arg5: memref<64x4xf32, #tpu.memory_space<vmem>>, %arg6: memref<4x64xf32, #tpu.memory_space<vmem>>, %arg7: memref<64x4xf32, #tpu.memory_space<vmem>>, %arg8: memref<4x64xf32, #tpu.memory_space<vmem>>, %arg9: memref<1x4xf32, #tpu.memory_space<vmem>>, %arg10: memref<1x4xf32, #tpu.memory_space<vmem>>, %arg11: memref<1x4xf32, #tpu.memory_space<vmem>>, %arg12: memref<1x4xf32, #tpu.memory_space<vmem>>, %arg13: memref<36x1xf32, #tpu.memory_space<vmem>>, %arg14: memref<16x128xf32, #tpu.memory_space<vmem>>, %arg15: memref<40x96xf32, #tpu.memory_space<vmem>>, %arg16: memref<40x64xf32, #tpu.memory_space<vmem>>, %arg17: memref<36x288xbf16, #tpu.memory_space<vmem>>, %arg18: memref<36x192xbf16, #tpu.memory_space<vmem>>) attributes {dimension_semantics = [], scalar_prefetch = 0 : i64, scratch_operands = 4 : i64, tpu.core_type = #tpu.core_type<tc>} {
    %c0 = arith.constant 0 : index
    %c0_0 = arith.constant 0 : index
    %0 = vector.load %arg13[%c0, %c0_0] : memref<36x1xf32, #tpu.memory_space<vmem>>, vector<36x1xf32>
    %cst = arith.constant 0.000000e+00 : f32
    %1 = vector.broadcast %cst : f32 to vector<40x96xf32>
    %c0_1 = arith.constant 0 : index
    %c0_2 = arith.constant 0 : index
    %2 = vector.load %arg15[%c0_1, %c0_2] : memref<40x96xf32, #tpu.memory_space<vmem>>, vector<40x96xf32>
    tpu.vector_store %arg15[%c0_1, %c0_2], %1 {strides = array<i32>} : memref<40x96xf32, #tpu.memory_space<vmem>>, vector<40x96xf32>,
    %c0_3 = arith.constant 0 : index
    %c0_4 = arith.constant 0 : index
    %3 = vector.load %arg1[%c0_3, %c0_4] : memref<32x64xf32, #tpu.memory_space<vmem>>, vector<16x64xf32>
    %c1 = arith.constant 1 : index
    %c0_5 = arith.constant 0 : index
    %4 = vector.load %arg15[%c1, %c0_5] : memref<40x96xf32, #tpu.memory_space<vmem>>, vector<16x64xf32>
    tpu.vector_store %arg15[%c1, %c0_5], %3 {strides = array<i32>} : memref<40x96xf32, #tpu.memory_space<vmem>>, vector<16x64xf32>,
    %c0_6 = arith.constant 0 : index
    %c0_7 = arith.constant 0 : index
    %5 = vector.load %arg2[%c0_6, %c0_7] : memref<16x8xf32, #tpu.memory_space<vmem>>, vector<16x8xf32>
    %c0_8 = arith.constant 0 : index
    %c0_9 = arith.constant 0 : index
    %6 = vector.load %arg0[%c0_8, %c0_9] : memref<16x32xf32, #tpu.memory_space<vmem>>, vector<8x32xf32>
    %cst_10 = arith.constant dense<0.000000e+00> : vector<16x32xf32>
    %7 = tpu.matmul %5, %6, %cst_10 {dimension_numbers = #tpu.dot_dimension_numbers<[1], [0], [0], [1], [0, 0, 1, 1], [], []>} : vector<16x8xf32>, vector<8x32xf32>, vector<16x32xf32> -> vector<16x32xf32>
    %c1_11 = arith.constant 1 : index
    %c64 = arith.constant 64 : index
    %8 = vector.load %arg15[%c1_11, %c64] : memref<40x96xf32, #tpu.memory_space<vmem>>, vector<16x32xf32>
    tpu.vector_store %arg15[%c1_11, %c64], %7 {strides = array<i32>} : memref<40x96xf32, #tpu.memory_space<vmem>>, vector<16x32xf32>,
    %c16 = arith.constant 16 : index
    %c0_12 = arith.constant 0 : index
    %9 = vector.load %arg1[%c16, %c0_12] : memref<32x64xf32, #tpu.memory_space<vmem>>, vector<16x64xf32>
    %c19 = arith.constant 19 : index
    %c0_13 = arith.constant 0 : index
    %10 = vector.load %arg15[%c19, %c0_13] : memref<40x96xf32, #tpu.memory_space<vmem>>, vector<16x64xf32>
    tpu.vector_store %arg15[%c19, %c0_13], %9 {strides = array<i32>} : memref<40x96xf32, #tpu.memory_space<vmem>>, vector<16x64xf32>,
    %c0_14 = arith.constant 0 : index
    %c0_15 = arith.constant 0 : index
    %11 = vector.load %arg2[%c0_14, %c0_15] : memref<16x8xf32, #tpu.memory_space<vmem>>, vector<16x8xf32>
    %c8 = arith.constant 8 : index
    %c0_16 = arith.constant 0 : index
    %12 = vector.load %arg0[%c8, %c0_16] : memref<16x32xf32, #tpu.memory_space<vmem>>, vector<8x32xf32>
    %cst_17 = arith.constant dense<0.000000e+00> : vector<16x32xf32>
    %13 = tpu.matmul %11, %12, %cst_17 {dimension_numbers = #tpu.dot_dimension_numbers<[1], [0], [0], [1], [0, 0, 1, 1], [], []>} : vector<16x8xf32>, vector<8x32xf32>, vector<16x32xf32> -> vector<16x32xf32>
    %c19_18 = arith.constant 19 : index
    %c64_19 = arith.constant 64 : index
    %14 = vector.load %arg15[%c19_18, %c64_19] : memref<40x96xf32, #tpu.memory_space<vmem>>, vector<16x32xf32>
    tpu.vector_store %arg15[%c19_18, %c64_19], %13 {strides = array<i32>} : memref<40x96xf32, #tpu.memory_space<vmem>>, vector<16x32xf32>,
    %c0_20 = arith.constant 0 : index
    %c0_21 = arith.constant 0 : index
    %15 = vector.load %arg15[%c0_20, %c0_21] : memref<40x96xf32, #tpu.memory_space<vmem>>, vector<40x96xf32>
    %16 = arith.truncf %15 : vector<40x96xf32> to vector<40x96xbf16>
    %17 = vector.extract_strided_slice %16 {offsets = [0, 0], sizes = [36, 96], strides = [1, 1]} : vector<40x96xbf16> to vector<36x96xbf16>
    %c0_22 = arith.constant 0 : index
    %c0_23 = arith.constant 0 : index
    %18 = vector.load %arg17[%c0_22, %c0_23] : memref<36x288xbf16, #tpu.memory_space<vmem>>, vector<36x96xbf16>
    tpu.vector_store %arg17[%c0_22, %c0_23], %17 {strides = array<i32>} : memref<36x288xbf16, #tpu.memory_space<vmem>>, vector<36x96xbf16>,
    %19 = vector.extract_strided_slice %16 {offsets = [1, 0], sizes = [36, 96], strides = [1, 1]} : vector<40x96xbf16> to vector<36x96xbf16>
    %c0_24 = arith.constant 0 : index
    %c96 = arith.constant 96 : index
    %20 = vector.load %arg17[%c0_24, %c96] : memref<36x288xbf16, #tpu.memory_space<vmem>>, vector<36x96xbf16>
    tpu.vector_store %arg17[%c0_24, %c96], %19 {strides = array<i32>} : memref<36x288xbf16, #tpu.memory_space<vmem>>, vector<36x96xbf16>,
    %21 = vector.extract_strided_slice %16 {offsets = [2, 0], sizes = [36, 96], strides = [1, 1]} : vector<40x96xbf16> to vector<36x96xbf16>
    %c0_25 = arith.constant 0 : index
    %c192 = arith.constant 192 : index
    %22 = vector.load %arg17[%c0_25, %c192] : memref<36x288xbf16, #tpu.memory_space<vmem>>, vector<36x96xbf16>
    tpu.vector_store %arg17[%c0_25, %c192], %21 {strides = array<i32>} : memref<36x288xbf16, #tpu.memory_space<vmem>>, vector<36x96xbf16>,
    %c0_26 = arith.constant 0 : index
    %c0_27 = arith.constant 0 : index
    %23 = vector.load %arg17[%c0_26, %c0_27] : memref<36x288xbf16, #tpu.memory_space<vmem>>, vector<36x288xbf16>
    %c0_28 = arith.constant 0 : index
    %c0_29 = arith.constant 0 : index
    %24 = vector.load %arg3[%c0_28, %c0_29] : memref<288x64xbf16, #tpu.memory_space<vmem>>, vector<288x64xbf16>
    %cst_30 = arith.constant dense<0.000000e+00> : vector<36x64xf32>
    %25 = tpu.matmul %23, %24, %cst_30 {dimension_numbers = #tpu.dot_dimension_numbers<[1], [0], [0], [1], [0, 0, 1, 1], [], []>} : vector<36x288xbf16>, vector<288x64xbf16>, vector<36x64xf32> -> vector<36x64xf32>
    %26 = vector.shape_cast %0 : vector<36x1xf32> to vector<36x1xf32>
    %27 = vector.broadcast %26 : vector<36x1xf32> to vector<36x64xf32>
    %28 = arith.mulf %25, %27 : vector<36x64xf32>
    %cst_31 = arith.constant dense<0.000000e+00> : vector<64xf32>
    %29 = vector.multi_reduction <add>, %28, %cst_31 [0] : vector<36x64xf32> to vector<64xf32>
    %30 = vector.shape_cast %29 : vector<64xf32> to vector<1x64xf32>
    %31 = arith.mulf %28, %25 : vector<36x64xf32>
    %cst_32 = arith.constant dense<0.000000e+00> : vector<64xf32>
    %32 = vector.multi_reduction <add>, %31, %cst_32 [0] : vector<36x64xf32> to vector<64xf32>
    %33 = vector.shape_cast %32 : vector<64xf32> to vector<1x64xf32>
    %c0_33 = arith.constant 0 : index
    %c0_34 = arith.constant 0 : index
    %34 = vector.load %arg5[%c0_33, %c0_34] : memref<64x4xf32, #tpu.memory_space<vmem>>, vector<64x4xf32>
    %cst_35 = arith.constant dense<0.000000e+00> : vector<1x4xf32>
    %35 = tpu.matmul %30, %34, %cst_35 {dimension_numbers = #tpu.dot_dimension_numbers<[1], [0], [0], [1], [0, 0, 1, 1], [], []>} : vector<1x64xf32>, vector<64x4xf32>, vector<1x4xf32> -> vector<1x4xf32>
    %cst_36 = arith.constant 0.001953125 : f32
    %36 = vector.broadcast %cst_36 : f32 to vector<1x4xf32>
    %37 = arith.mulf %35, %36 : vector<1x4xf32>
    %c0_37 = arith.constant 0 : index
    %c0_38 = arith.constant 0 : index
    %38 = vector.load %arg5[%c0_37, %c0_38] : memref<64x4xf32, #tpu.memory_space<vmem>>, vector<64x4xf32>
    %cst_39 = arith.constant dense<0.000000e+00> : vector<1x4xf32>
    %39 = tpu.matmul %33, %38, %cst_39 {dimension_numbers = #tpu.dot_dimension_numbers<[1], [0], [0], [1], [0, 0, 1, 1], [], []>} : vector<1x64xf32>, vector<64x4xf32>, vector<1x4xf32> -> vector<1x4xf32>
    %cst_40 = arith.constant 0.001953125 : f32
    %40 = vector.broadcast %cst_40 : f32 to vector<1x4xf32>
    %41 = arith.mulf %39, %40 : vector<1x4xf32>
    %42 = arith.mulf %37, %37 : vector<1x4xf32>
    %43 = arith.subf %41, %42 : vector<1x4xf32>
    %c0_41 = arith.constant 0 : index
    %c0_42 = arith.constant 0 : index
    %44 = vector.load %arg9[%c0_41, %c0_42] : memref<1x4xf32, #tpu.memory_space<vmem>>, vector<1x4xf32>
    %cst_43 = arith.constant 9.99999974E-6 : f32
    %45 = vector.broadcast %cst_43 : f32 to vector<1x4xf32>
    %46 = arith.addf %43, %45 : vector<1x4xf32>
    %47 = math.rsqrt %46 : vector<1x4xf32>
    %48 = arith.mulf %44, %47 : vector<1x4xf32>
    %c0_44 = arith.constant 0 : index
    %c0_45 = arith.constant 0 : index
    %49 = vector.load %arg10[%c0_44, %c0_45] : memref<1x4xf32, #tpu.memory_space<vmem>>, vector<1x4xf32>
    %50 = arith.mulf %37, %48 : vector<1x4xf32>
    %51 = arith.subf %49, %50 : vector<1x4xf32>
    %c0_46 = arith.constant 0 : index
    %c0_47 = arith.constant 0 : index
    %52 = vector.load %arg6[%c0_46, %c0_47] : memref<4x64xf32, #tpu.memory_space<vmem>>, vector<4x64xf32>
    %cst_48 = arith.constant dense<0.000000e+00> : vector<1x64xf32>
    %53 = tpu.matmul %48, %52, %cst_48 {dimension_numbers = #tpu.dot_dimension_numbers<[1], [0], [0], [1], [0, 0, 1, 1], [], []>} : vector<1x4xf32>, vector<4x64xf32>, vector<1x64xf32> -> vector<1x64xf32>
    %c0_49 = arith.constant 0 : index
    %c0_50 = arith.constant 0 : index
    %54 = vector.load %arg6[%c0_49, %c0_50] : memref<4x64xf32, #tpu.memory_space<vmem>>, vector<4x64xf32>
    %cst_51 = arith.constant dense<0.000000e+00> : vector<1x64xf32>
    %55 = tpu.matmul %51, %54, %cst_51 {dimension_numbers = #tpu.dot_dimension_numbers<[1], [0], [0], [1], [0, 0, 1, 1], [], []>} : vector<1x4xf32>, vector<4x64xf32>, vector<1x64xf32> -> vector<1x64xf32>
    %56 = vector.broadcast %53 : vector<1x64xf32> to vector<36x64xf32>
    %57 = arith.mulf %25, %56 : vector<36x64xf32>
    %58 = vector.broadcast %55 : vector<1x64xf32> to vector<36x64xf32>
    %59 = arith.addf %57, %58 : vector<36x64xf32>
    %cst_52 = arith.constant 0.000000e+00 : f32
    %60 = vector.broadcast %cst_52 : f32 to vector<36x64xf32>
    %61 = arith.maximumf %59, %60 : vector<36x64xf32>
    %62 = arith.mulf %61, %27 : vector<36x64xf32>
    %cst_53 = arith.constant 0.000000e+00 : f32
    %63 = vector.broadcast %cst_53 : f32 to vector<40x64xf32>
    %c0_54 = arith.constant 0 : index
    %c0_55 = arith.constant 0 : index
    %64 = vector.load %arg16[%c0_54, %c0_55] : memref<40x64xf32, #tpu.memory_space<vmem>>, vector<40x64xf32>
    tpu.vector_store %arg16[%c0_54, %c0_55], %63 {strides = array<i32>} : memref<40x64xf32, #tpu.memory_space<vmem>>, vector<40x64xf32>,
    %c1_56 = arith.constant 1 : index
    %c0_57 = arith.constant 0 : index
    %65 = vector.load %arg16[%c1_56, %c0_57] : memref<40x64xf32, #tpu.memory_space<vmem>>, vector<36x64xf32>
    tpu.vector_store %arg16[%c1_56, %c0_57], %62 {strides = array<i32>} : memref<40x64xf32, #tpu.memory_space<vmem>>, vector<36x64xf32>,
    %c0_58 = arith.constant 0 : index
    %c0_59 = arith.constant 0 : index
    %66 = vector.load %arg16[%c0_58, %c0_59] : memref<40x64xf32, #tpu.memory_space<vmem>>, vector<40x64xf32>
    %67 = arith.truncf %66 : vector<40x64xf32> to vector<40x64xbf16>
    %68 = vector.extract_strided_slice %67 {offsets = [0, 0], sizes = [36, 64], strides = [1, 1]} : vector<40x64xbf16> to vector<36x64xbf16>
    %c0_60 = arith.constant 0 : index
    %c0_61 = arith.constant 0 : index
    %69 = vector.load %arg18[%c0_60, %c0_61] : memref<36x192xbf16, #tpu.memory_space<vmem>>, vector<36x64xbf16>
    tpu.vector_store %arg18[%c0_60, %c0_61], %68 {strides = array<i32>} : memref<36x192xbf16, #tpu.memory_space<vmem>>, vector<36x64xbf16>,
    %70 = vector.extract_strided_slice %67 {offsets = [1, 0], sizes = [36, 64], strides = [1, 1]} : vector<40x64xbf16> to vector<36x64xbf16>
    %c0_62 = arith.constant 0 : index
    %c64_63 = arith.constant 64 : index
    %71 = vector.load %arg18[%c0_62, %c64_63] : memref<36x192xbf16, #tpu.memory_space<vmem>>, vector<36x64xbf16>
    tpu.vector_store %arg18[%c0_62, %c64_63], %70 {strides = array<i32>} : memref<36x192xbf16, #tpu.memory_space<vmem>>, vector<36x64xbf16>,
    %72 = vector.extract_strided_slice %67 {offsets = [2, 0], sizes = [36, 64], strides = [1, 1]} : vector<40x64xbf16> to vector<36x64xbf16>
    %c0_64 = arith.constant 0 : index
    %c128 = arith.constant 128 : index
    %73 = vector.load %arg18[%c0_64, %c128] : memref<36x192xbf16, #tpu.memory_space<vmem>>, vector<36x64xbf16>
    tpu.vector_store %arg18[%c0_64, %c128], %72 {strides = array<i32>} : memref<36x192xbf16, #tpu.memory_space<vmem>>, vector<36x64xbf16>,
    %c0_65 = arith.constant 0 : index
    %c0_66 = arith.constant 0 : index
    %74 = vector.load %arg18[%c0_65, %c0_66] : memref<36x192xbf16, #tpu.memory_space<vmem>>, vector<36x192xbf16>
    %c0_67 = arith.constant 0 : index
    %c0_68 = arith.constant 0 : index
    %75 = vector.load %arg4[%c0_67, %c0_68] : memref<192x64xbf16, #tpu.memory_space<vmem>>, vector<192x64xbf16>
    %cst_69 = arith.constant dense<0.000000e+00> : vector<36x64xf32>
    %76 = tpu.matmul %74, %75, %cst_69 {dimension_numbers = #tpu.dot_dimension_numbers<[1], [0], [0], [1], [0, 0, 1, 1], [], []>} : vector<36x192xbf16>, vector<192x64xbf16>, vector<36x64xf32> -> vector<36x64xf32>
    %77 = vector.shape_cast %0 : vector<36x1xf32> to vector<36x1xf32>
    %78 = vector.broadcast %77 : vector<36x1xf32> to vector<36x64xf32>
    %79 = arith.mulf %76, %78 : vector<36x64xf32>
    %cst_70 = arith.constant dense<0.000000e+00> : vector<64xf32>
    %80 = vector.multi_reduction <add>, %79, %cst_70 [0] : vector<36x64xf32> to vector<64xf32>
    %81 = vector.shape_cast %80 : vector<64xf32> to vector<1x64xf32>
    %82 = arith.mulf %79, %76 : vector<36x64xf32>
    %cst_71 = arith.constant dense<0.000000e+00> : vector<64xf32>
    %83 = vector.multi_reduction <add>, %82, %cst_71 [0] : vector<36x64xf32> to vector<64xf32>
    %84 = vector.shape_cast %83 : vector<64xf32> to vector<1x64xf32>
    %c0_72 = arith.constant 0 : index
    %c0_73 = arith.constant 0 : index
    %85 = vector.load %arg7[%c0_72, %c0_73] : memref<64x4xf32, #tpu.memory_space<vmem>>, vector<64x4xf32>
    %cst_74 = arith.constant dense<0.000000e+00> : vector<1x4xf32>
    %86 = tpu.matmul %81, %85, %cst_74 {dimension_numbers = #tpu.dot_dimension_numbers<[1], [0], [0], [1], [0, 0, 1, 1], [], []>} : vector<1x64xf32>, vector<64x4xf32>, vector<1x4xf32> -> vector<1x4xf32>
    %cst_75 = arith.constant 0.001953125 : f32
    %87 = vector.broadcast %cst_75 : f32 to vector<1x4xf32>
    %88 = arith.mulf %86, %87 : vector<1x4xf32>
    %c0_76 = arith.constant 0 : index
    %c0_77 = arith.constant 0 : index
    %89 = vector.load %arg7[%c0_76, %c0_77] : memref<64x4xf32, #tpu.memory_space<vmem>>, vector<64x4xf32>
    %cst_78 = arith.constant dense<0.000000e+00> : vector<1x4xf32>
    %90 = tpu.matmul %84, %89, %cst_78 {dimension_numbers = #tpu.dot_dimension_numbers<[1], [0], [0], [1], [0, 0, 1, 1], [], []>} : vector<1x64xf32>, vector<64x4xf32>, vector<1x4xf32> -> vector<1x4xf32>
    %cst_79 = arith.constant 0.001953125 : f32
    %91 = vector.broadcast %cst_79 : f32 to vector<1x4xf32>
    %92 = arith.mulf %90, %91 : vector<1x4xf32>
    %93 = arith.mulf %88, %88 : vector<1x4xf32>
    %94 = arith.subf %92, %93 : vector<1x4xf32>
    %c0_80 = arith.constant 0 : index
    %c0_81 = arith.constant 0 : index
    %95 = vector.load %arg11[%c0_80, %c0_81] : memref<1x4xf32, #tpu.memory_space<vmem>>, vector<1x4xf32>
    %cst_82 = arith.constant 9.99999974E-6 : f32
    %96 = vector.broadcast %cst_82 : f32 to vector<1x4xf32>
    %97 = arith.addf %94, %96 : vector<1x4xf32>
    %98 = math.rsqrt %97 : vector<1x4xf32>
    %99 = arith.mulf %95, %98 : vector<1x4xf32>
    %c0_83 = arith.constant 0 : index
    %c0_84 = arith.constant 0 : index
    %100 = vector.load %arg12[%c0_83, %c0_84] : memref<1x4xf32, #tpu.memory_space<vmem>>, vector<1x4xf32>
    %101 = arith.mulf %88, %99 : vector<1x4xf32>
    %102 = arith.subf %100, %101 : vector<1x4xf32>
    %c0_85 = arith.constant 0 : index
    %c0_86 = arith.constant 0 : index
    %103 = vector.load %arg8[%c0_85, %c0_86] : memref<4x64xf32, #tpu.memory_space<vmem>>, vector<4x64xf32>
    %cst_87 = arith.constant dense<0.000000e+00> : vector<1x64xf32>
    %104 = tpu.matmul %99, %103, %cst_87 {dimension_numbers = #tpu.dot_dimension_numbers<[1], [0], [0], [1], [0, 0, 1, 1], [], []>} : vector<1x4xf32>, vector<4x64xf32>, vector<1x64xf32> -> vector<1x64xf32>
    %c0_88 = arith.constant 0 : index
    %c0_89 = arith.constant 0 : index
    %105 = vector.load %arg8[%c0_88, %c0_89] : memref<4x64xf32, #tpu.memory_space<vmem>>, vector<4x64xf32>
    %cst_90 = arith.constant dense<0.000000e+00> : vector<1x64xf32>
    %106 = tpu.matmul %102, %105, %cst_90 {dimension_numbers = #tpu.dot_dimension_numbers<[1], [0], [0], [1], [0, 0, 1, 1], [], []>} : vector<1x4xf32>, vector<4x64xf32>, vector<1x64xf32> -> vector<1x64xf32>
    %107 = vector.broadcast %104 : vector<1x64xf32> to vector<36x64xf32>
    %108 = arith.mulf %76, %107 : vector<36x64xf32>
    %109 = vector.broadcast %106 : vector<1x64xf32> to vector<36x64xf32>
    %110 = arith.addf %108, %109 : vector<36x64xf32>
    %cst_91 = arith.constant 0.000000e+00 : f32
    %111 = vector.broadcast %cst_91 : f32 to vector<36x64xf32>
    %112 = arith.maximumf %110, %111 : vector<36x64xf32>
    %113 = arith.mulf %112, %78 : vector<36x64xf32>
    %114 = vector.extract_strided_slice %113 {offsets = [0, 0], sizes = [16, 64], strides = [1, 1]} : vector<36x64xf32> to vector<16x64xf32>
    %c0_92 = arith.constant 0 : index
    %c0_93 = arith.constant 0 : index
    %115 = vector.load %arg14[%c0_92, %c0_93] : memref<16x128xf32, #tpu.memory_space<vmem>>, vector<16x64xf32>
    tpu.vector_store %arg14[%c0_92, %c0_93], %114 {strides = array<i32>} : memref<16x128xf32, #tpu.memory_space<vmem>>, vector<16x64xf32>,
    %116 = vector.extract_strided_slice %113 {offsets = [18, 0], sizes = [16, 64], strides = [1, 1]} : vector<36x64xf32> to vector<16x64xf32>
    %c0_94 = arith.constant 0 : index
    %c64_95 = arith.constant 64 : index
    %117 = vector.load %arg14[%c0_94, %c64_95] : memref<16x128xf32, #tpu.memory_space<vmem>>, vector<16x64xf32>
    tpu.vector_store %arg14[%c0_94, %c64_95], %116 {strides = array<i32>} : memref<16x128xf32, #tpu.memory_space<vmem>>, vector<16x64xf32>,
    return
  }
}

</mosaic_0001>

<bundles_post_ra>
// kernel: up_forward.1
= control target key start
LH: loop header
LB: loop body
LE: loop exit
PB: predicated region body
PF: predicated region fallthrough
CT: control target
= control target key end

     0   :  { %vm67_vm0 = vcmask 64512   ;;  %vm53_vm1 = vcmask 785408   ;;  %vm61_vm2 = vcmask 523264   ;;  %v1554_v5 = vmov 0.0   ;;  %s1556_s17 = smov 96   ;;  %s2114_s0 = inlined_call_operand.vmem [shape: f32[16,32], index: 0, kind: input, shape index: {}]   ;;  %s2115_s2 = inlined_call_operand.vmem [shape: f32[16,8], index: 2, kind: input, shape index: {}]   ;;  %s2116_s1 = inlined_call_operand.vmem [shape: f32[32,64], index: 1, kind: input, shape index: {}]   ;;  %s2117_s3 = inlined_call_operand.vmem [shape: bf16[288,64], index: 3, kind: input, shape index: {}]   ;;  %s2118_s13 = inlined_call_operand.vmem [shape: f32[36,1], index: 13, kind: input, shape index: {}]   ;;  %s2119_s5 = inlined_call_operand.vmem [shape: f32[64,4], index: 5, kind: input, shape index: {}]   ;;  %s2120_s6 = inlined_call_operand.vmem [shape: f32[4,64], index: 6, kind: input, shape index: {}]   ;;  %s2121_s9 = inlined_call_operand.vmem [shape: f32[1,4], index: 9, kind: input, shape index: {}]   ;;  %s2122_s10 = inlined_call_operand.vmem [shape: f32[1,4], index: 10, kind: input, shape index: {}]   ;;  %s2123_s4 = inlined_call_operand.vmem [shape: bf16[192,64], index: 4, kind: input, shape index: {}]   ;;  %s2124_s7 = inlined_call_operand.vmem [shape: f32[64,4], index: 7, kind: input, shape index: {}]   ;;  %s2125_s8 = inlined_call_operand.vmem [shape: f32[4,64], index: 8, kind: input, shape index: {}]   ;;  %s2126_s11 = inlined_call_operand.vmem [shape: f32[1,4], index: 11, kind: input, shape index: {}]   ;;  %s2127_s12 = inlined_call_operand.vmem [shape: f32[1,4], index: 12, kind: input, shape index: {}]   ;;  %s2128_s14 = inlined_call_operand.vmem [shape: f32[16,128], index: 14, kind: output, shape index: {}]  }
   0x1   :  { %v66_v0 = vld [vmem:[%s2114_s0] sm:$0xff]  ;;  %v114_v2 = vld [vmem:[%s2114_s0 + $0x8] sm:$0xff]  ;;  %54 = vst.msk [vmem:[#allocation2] sm:$0xff] %vm53_vm1, %v1554_v5  ;;  %s1555_s0 = smov 64   ;;  %v108_v10 = vld [vmem:[%s2116_s1 + $0x10] sm:$0xff]  ;;  %vm105_vm3 = vcmask 785920  }
   0x2   :  { %v64_v1 = vld [vmem:[%s2115_s2] sm:$0xff]  ;;  %89 = vmatpush.msra.mxu2 %v66_v0  ;;  %136 = vmatpush.msra.mxu3 %v114_v2  ;;  %v65_v3 = vld [vmem:[%s2115_s2 + $0x8] sm:$0xff]  ;;  %55 = vst.msk [vmem:[#allocation2 + $0x8] sm:$0xff] %vm53_vm1, %v1554_v5  ;;  %v109_v12 = vld [vmem:[%s2116_s1 + $0x18] sm:$0xff]  ;;  %vm164_vm4 = vcmask 781312   ;;  %vm265_vm5 = vcmask 1042432  }
   0x3   :  { %1319 = vmatmul.msk.f32.vlgmr.msra.gmra.mxu2 %vm67_vm0, %v64_v1  ;;  %1321 = vmatmul.msk.f32.vlgmr.msra.gmra.mxu3 %vm67_vm0, %v64_v1  ;;  %v59_v4 = vld [vmem:[%s2116_s1] sm:$0xff]  ;;  %56 = vst.msk [vmem:[#allocation2 + $0x10] sm:$0xff] %vm53_vm1, %v1554_v5  ;;  %v60_v11 = vld [vmem:[%s2116_s1 + $0x8] sm:$0xff]  ;;  %vm266_vm6 = vcmask 1046532   ;;  %v1516_v26 = vld [vmem:[%s2117_s3 + $0x38] sm:$0xff]  ;;  %vm169_vm10 = vcmask 779264  }
   0x4   :  { %62 = vst.msk [vmem:[#allocation2 + $0x1] sm:$0xff] %vm61_vm2, %v59_v4  ;;  %vm171_vm7 = vsmask.f32 3328  ;;  %vm172_vm8 = vsmask.f32 7440  ;;  %vm1679_vm9 = vmor %vm265_vm5, %vm266_vm6  ;;  %523 = vmatpush.bf16.msrb.mxu2 %v1516_v26  ;;  %v1515_v34 = vld [vmem:[%s2117_s3 + $0x30] sm:$0xff] }
   0x5   :  { %57 = vst.msk [vmem:[#allocation2 + $0x18] sm:$0xff] %vm53_vm1, %v1554_v5  ;;  %vm1692_vm11 = vmor %vm171_vm7, %vm172_vm8  ;;  %v1514_v51 = vld [vmem:[%s2117_s3 + $0x28] sm:$0xff]  ;;  %vm249_vm12 = vcmask 1044224   ;;  %vm250_vm13 = vcmask 523268   ;;  %vm308_vm15 = vcmask 1043968   ;;  %vm256_vm5 = vcmask 1042176  }
   0x6   :  { %58 = vst.msk [vmem:[#allocation2 + $0x20] sm:$0xff] %vm53_vm1, %v1554_v5  ;;  %vm1769_vm14 = vmor %vm250_vm13, %vm249_vm12  ;;  %vm257_vm6 = vcmask 521220   ;;  %vm315_vm7 = vcmask 1041920   ;;  %vm316_vm8 = vcmask 259076   ;;  %vm737_vm13 = vcmask 1043456   ;;  %v1533_v39 = vld [vmem:[%s2123_s4 + $0x10] sm:$0xff] }
   0x7   :  { %806 = vst.msk [vmem:[#allocation3] sm:$0xff] %vm61_vm2, %v1554_v5  ;;  %vm317_vm12 = vmor %vm316_vm8, %vm315_vm7  ;;  %vm1310_vm8 = vcmask 1048066  }
   0x8   :  { %807 = vst.msk [vmem:[#allocation3 + $0x8] sm:$0xff] %vm61_vm2, %v1554_v5  ;;  %524 = vmatpush.bf16.msrb.mxu2 %v1515_v34  ;;  %v1525_v34 = vld [vmem:[%s2117_s3 + $0x80] sm:$0xff] }
   0x9   :  { %808 = vst.msk [vmem:[#allocation3 + $0x10] sm:$0xff] %vm61_vm2, %v1554_v5 }
   0xa   :  { %809 = vst.msk [vmem:[#allocation3 + $0x18] sm:$0xff] %vm61_vm2, %v1554_v5 }
   0xb   :  { %1320 = vmatmul.msk.f32.gmra.mxu2 %vm67_vm0, %v65_v3  ;;  %1322 = vmatmul.msk.f32.gmra.mxu3 %vm67_vm0, %v65_v3  ;;  %810 = vst.msk [vmem:[#allocation3 + $0x20] sm:$0xff] %vm61_vm2, %v1554_v5  ;;  %vm309_vm0 = vcmask 261124  }
   0xc   :  { %110 = vst.msk [vmem:[#allocation2 + $0x13] sm:$0xff] %vm61_vm2, %v108_v10  ;;  %525 = vmatpush.bf16.msrb.mxu2 %v1514_v51 }
   0xd   :  { %63 = vst.msk [vmem:[#allocation2 + $0x9] sm:$0xff] %vm61_vm2, %v60_v11 }
   0xe   :  { %111 = vst.msk [vmem:[#allocation2 + $0x1b] sm:$0xff] %vm61_vm2, %v109_v12 }
  0x86   :  { %v91_v6 = vpop.f32.mrf.mxu2  ;;  %v138_v7 = vpop.f32.mrf.mxu3 }
  0x87   :  { %99 = vrot.lane.b32.xlu0 %v91_v6, %s1555_s0  ;;  %146 = vrot.lane.b32.xlu1 %v138_v7, %s1555_s0 }
  0x8e   :  { %v94_v8 = vpop.f32.mrf.mxu2  ;;  %v141_v9 = vpop.f32.mrf.mxu3 }
  0x8f   :  { %101 = vrot.lane.b32.xlu0 %v94_v8, %s1555_s0  ;;  %148 = vrot.lane.b32.xlu1 %v141_v9, %s1555_s0 }
  0xf9   :  { %v100_v13 = vpop.permute.xlu0 %99  ;;  %v147_v14 = vpop.permute.xlu1 %146 }
  0xfa   :  { %106 = vst.msk [vmem:[#allocation2 + $0x1] sm:$0xff] %vm105_vm3, %v100_v13 }
  0xfb   :  { %152 = vst.msk [vmem:[#allocation2 + $0x13] sm:$0xff] %vm105_vm3, %v147_v14 }
 0x101   :  { %v102_v15 = vpop.permute.xlu0 %101  ;;  %v149_v16 = vpop.permute.xlu1 %148  ;;  %v154_v17 = vld [vmem:[#allocation2] sm:$0xff] }
 0x102   :  { %107 = vst.msk [vmem:[#allocation2 + $0x9] sm:$0xff] %vm105_vm3, %v102_v15  ;;  %v159_v18 = vpack.c.bf16 %v154_v17, %v154_v17  ;;  %v1513_v15 = vld [vmem:[%s2117_s3 + $0x20] sm:$0xff]  ;;  %v1512_v17 = vld [vmem:[%s2117_s3 + $0x18] sm:$0xff] }
 0x103   :  { %153 = vst.msk [vmem:[#allocation2 + $0x1b] sm:$0xff] %vm105_vm3, %v149_v16  ;;  %v1524_v16 = vld [vmem:[%s2117_s3 + $0x78] sm:$0xff]  ;;  %526 = vmatpush.bf16.msrb.mxu2 %v1513_v15  ;;  %vm1795_vm3 = vmor %vm309_vm0, %vm308_vm15 }
 0x104   :  { %v175_v19 = vshrl.u32 %v159_v18, 16  ;;  %v178_v20 = vshll.u32 %v159_v18, 16  ;;  %165 = vst.msk [vmem:[#allocation4] sm:$0xf] %vm164_vm4, %v159_v18  ;;  %v1323_v35 = vrot.slane %v159_v18, 9  ;;  %546 = vmatpush.bf16.msrb.mxu3 %v1524_v16  ;;  %v1511_v18 = vld [vmem:[%s2117_s3 + $0x10] sm:$0xff] }
 0x105   :  { %v52_v16 = vld [vmem:[%s2118_s13 + $0x20] sm:$0xf] }
 0x106   :  { %v177_v21 = vrot.slane %v175_v19, 4  ;;  %v180_v22 = vrot.slane %v178_v20, 5  ;;  %v1523_v19 = vld [vmem:[%s2117_s3 + $0x70] sm:$0xff]  ;;  %v1510_v20 = vld [vmem:[%s2117_s3 + $0x8] sm:$0xff] }
 0x107   :  { %527 = vmatpush.bf16.msrb.mxu2 %v1512_v17  ;;  %v51_v17 = vld [vmem:[%s2118_s13 + $0x18] sm:$0xff] }
 0x108   :  { %v181_v25 = vor.u32 %v180_v22, %v177_v21  ;;  %547 = vmatpush.bf16.msrb.mxu3 %v1523_v19  ;;  %v1522_v21 = vld [vmem:[%s2117_s3 + $0x68] sm:$0xff]  ;;  %v1509_v22 = vld [vmem:[%s2117_s3] sm:$0xff] }
 0x109   :  { %v155_v23 = vld [vmem:[#allocation2 + $0x8] sm:$0xff]  ;;  %v156_v24 = vld [vmem:[#allocation2 + $0x10] sm:$0xff] }
 0x10a   :  { %v160_v27 = vpack.c.bf16 %v155_v23, %v155_v23  ;;  %v161_v28 = vpack.c.bf16 %v156_v24, %v156_v24  ;;  %v157_v29 = vld [vmem:[#allocation2 + $0x18] sm:$0xff]  ;;  %v158_v30 = vld [vmem:[#allocation2 + $0x20] sm:$0xff]  ;;  %v182_v40 = vrot.slane %v181_v25, 4  ;;  %v1519_v25 = vld [vmem:[%s2117_s3 + $0x50] sm:$0xff] }
 0x10b   :  { %v1683_v32 = vpack.c.bf16 %v157_v29, %v157_v29  ;;  %v1685_v33 = vpack.c.bf16 %v158_v30, %v158_v30  ;;  %528 = vmatpush.bf16.msrb.mxu2 %v1511_v18  ;;  %v1521_v23 = vld [vmem:[%s2117_s3 + $0x60] sm:$0xff]  ;;  %v1520_v24 = vld [vmem:[%s2117_s3 + $0x58] sm:$0xff]  ;;  %v1518_v30 = vld [vmem:[%s2117_s3 + $0x48] sm:$0xff] }
 0x10c   :  { %v270_v36 = vrot.slane %v160_v27, 5  ;;  %v184_v37 = vshll.u32 %v160_v27, 16  ;;  %v188_v38 = vshrl.u32 %v160_v27, 16  ;;  %166 = vst.msk [vmem:[#allocation4 + $0xc] sm:$0xf] %vm164_vm4, %v160_v27  ;;  %v273_v46 = vrot.slane %v161_v28, 5  ;;  %548 = vmatpush.bf16.msrb.mxu3 %v1522_v21 }
 0x10d   :  { %v204_v41 = vshll.u32 %v1683_v32, 16  ;;  %v208_v42 = vshrl.u32 %v1683_v32, 16  ;;  %v214_v43 = vshll.u32 %v1685_v33, 16  ;;  %167 = vst.msk [vmem:[#allocation4 + $0x18] sm:$0xf] %vm164_vm4, %v161_v28  ;;  %v194_v54 = vshll.u32 %v161_v28, 16 }
 0x10e   :  { %v271_v44 = vsel %vm1679_vm9, %v1323_v35, %v270_v36  ;;  %v272_v45 = vrot.slane %v270_v36, 4  ;;  %v186_v47 = vrot.slane %v184_v37, 5  ;;  %168 = vst.msk [vmem:[#allocation4 + $0x24] sm:$0xf] %vm164_vm4, %v1683_v32  ;;  %v190_v50 = vrot.slane %v188_v38, 4 }
 0x10f   :  { %282 = vrot.lane.b32.xlu0 %v271_v44, %s1555_s0  ;;  %v206_v48 = vrot.slane %v204_v41, 5  ;;  %v210_v49 = vrot.slane %v208_v42, 4  ;;  %170 = vst.msk [vmem:[#allocation4 + $0x30] sm:$0x3] %vm169_vm10, %v1685_v33  ;;  %v216_v56 = vrot.slane %v214_v43, 5  ;;  %v218_v58 = vshrl.u32 %v1685_v33, 16  ;;  %529 = vmatpush.bf16.msrb.mxu2 %v1510_v20  ;;  %vm258_vm10 = vmor %vm257_vm6, %vm256_vm5 }
 0x110   :  { %v274_v52 = vsel %vm1679_vm9, %v272_v45, %v273_v46  ;;  %v187_v53 = vsel %vm1692_vm11, %v182_v40, %v186_v47  ;;  %v191_v57 = vor.u32 %v190_v50, %v186_v47  ;;  %v198_v59 = vshrl.u32 %v161_v28, 16  ;;  %549 = vmatpush.bf16.msrb.mxu3 %v1521_v23 }
 0x111   :  { %284 = vrot.lane.b32.xlu1 %v274_v52, %s1555_s0  ;;  %223 = vrot.lane.b32.xlu2 %v187_v53, %s1556_s17  ;;  %v211_v55 = vor.u32 %v210_v49, %v206_v48  ;;  %v276_v61 = vrot.slane %v1683_v32, 5  ;;  %v220_v62 = vrot.slane %v218_v58, 4  ;;  %v275_v63 = vrot.slane %v273_v46, 4  ;;  %v1526_v32 = vld [vmem:[%s2117_s3 + $0x88] sm:$0xff]  ;;  %v661_v46 = vld [vmem:[%s2119_s5 + $0x18] sm:$0xff] }
 0x112   :  { %v192_v0 = vrot.slane %v191_v57, 4  ;;  %v196_v1 = vrot.slane %v194_v54, 5  ;;  %v200_v2 = vrot.slane %v198_v59, 4  ;;  %v279_v10 = vrot.slane %v1685_v33, 5  ;;  %575 = vmatpush.bf16.msra.mxu0 %v1526_v32  ;;  %v1517_v33 = vld [vmem:[%s2117_s3 + $0x40] sm:$0xff]  ;;  %v49_v53 = vld [vmem:[%s2118_s13 + $0x8] sm:$0xff] }
 0x113   :  { %v212_v60 = vrot.slane %v211_v55, 4  ;;  %v221_v4 = vor.u32 %v220_v62, %v216_v56  ;;  %v277_v5 = vsel %vm1679_vm9, %v275_v63, %v276_v61  ;;  %v278_v13 = vrot.slane %v276_v61, 4  ;;  %530 = vmatpush.bf16.msrb.mxu2 %v1509_v22 }
 0x114   :  { %v197_v6 = vsel %vm1692_vm11, %v192_v0, %v196_v1  ;;  %v201_v7 = vor.u32 %v200_v2, %v196_v1  ;;  %v281_v11 = vrot.slane %v279_v10, 4  ;;  %550 = vmatpush.bf16.msrb.mxu3 %v1520_v24  ;;  %v1557_v54 = vmov 0  }
 0x115   :  { %v217_v3 = vsel %vm1692_vm11, %v212_v60, %v216_v56  ;;  %v222_v8 = vrot.slane %v221_v4, 4  ;;  %v280_v14 = vsel %vm1679_vm9, %v278_v13, %v279_v10  ;;  %1548 = vset.pattern.permute.xlu0 %v1557_v54  ;;  %1549 = vset.pattern.permute.xlu1 %v1557_v54  ;;  %vm513_vm4 = vcmask 261120  }
 0x116   :  { %v202_v9 = vrot.slane %v201_v7, 4  ;;  %576 = vmatpush.bf16.msra.mxu0 %v1525_v34  ;;  %1547 = vset.pattern.permute.xlu2 %v1557_v54  ;;  %v48_v7 = vld [vmem:[%s2118_s13] sm:$0xff]  ;;  %vm830_vm5 = vcmask 517120   ;;  %vm1312_vm6 = vcmask 1048064  }
 0x117   :  { %229 = vrot.lane.b32.xlu0 %v217_v3, %s1556_s17 }
 0x118   :  { %v207_v12 = vsel %vm1692_vm11, %v202_v9, %v206_v48  ;;  %551 = vmatpush.bf16.msrb.mxu3 %v1519_v25 }
 0x119   :  { %286 = vrot.lane.b32.xlu1 %v277_v5, %s1555_s0  ;;  %225 = vrot.lane.b32.xlu2 %v197_v6, %s1556_s17  ;;  %v50_v6 = vld [vmem:[%s2118_s13 + $0x10] sm:$0xff] }
 0x11c   :  { %552 = vmatpush.bf16.msrb.mxu3 %v1518_v30 }
 0x11f   :  { %231 = vrot.lane.b32.xlu0 %v222_v8, %s1556_s17 }
 0x120   :  { %553 = vmatpush.bf16.msrb.mxu3 %v1517_v33 }
 0x121   :  { %290 = vrot.lane.b32.xlu1 %v281_v11, %s1555_s0  ;;  %227 = vrot.lane.b32.xlu2 %v207_v12, %s1556_s17 }
 0x127   :  { %599 = vperm.xlu0 %1548, %v49_v53  }
 0x129   :  { %288 = vrot.lane.b32.xlu2 %v280_v14, %s1555_s0  ;;  %604 = vperm.xlu1 %1549, %v50_v6  }
 0x131   :  { %594 = vperm.xlu2 %1547, %v48_v7   ;;  %614 = vperm.xlu1 %1549, %v52_v16  }
 0x139   :  { %609 = vperm.xlu2 %1547, %v51_v17  }
 0x16b   :  { %v224_v26 = vpop.permute.xlu2 %223 }
 0x16c   :  { %v233_v28 = vrot.slane %v224_v26, 4 }
 0x16e   :  { %v239_v29 = vsel %vm53_vm1, %v233_v28, %v224_v26 }
 0x16f   :  { %252 = vst.msk [vmem:[#allocation4] sm:$0xff] %vm1769_vm14, %v239_v29 }
 0x173   :  { %v226_v35 = vpop.permute.xlu2 %225 }
 0x174   :  { %v234_v36 = vrot.slane %v226_v35, 4 }
 0x176   :  { %v240_v37 = vsel %vm53_vm1, %v234_v36, %v226_v35  ;;  %v1326_v42 = vld [vmem:[#allocation4] sm:$0xf] }
 0x177   :  { %253 = vst.msk [vmem:[#allocation4 + $0xc] sm:$0xff] %vm1769_vm14, %v240_v37 }
 0x17b   :  { %v228_v38 = vpop.permute.xlu2 %227 }
 0x17c   :  { %v235_v40 = vrot.slane %v228_v38, 4 }
 0x17e   :  { %v241_v41 = vsel %vm53_vm1, %v235_v40, %v228_v38  ;;  %v1504_v43 = vld [vmem:[#allocation4 + $0x8] sm:$0xf0] }
 0x17f   :  { %254 = vst.msk [vmem:[#allocation4 + $0x18] sm:$0xff] %vm1769_vm14, %v241_v41  ;;  %v1327_v44 = vor.u32 %v1504_v43, %v1326_v42  ;;  %v665_v38 = vld [vmem:[%s2119_s5 + $0x38] sm:$0xff]  ;;  %v664_v41 = vld [vmem:[%s2119_s5 + $0x30] sm:$0xff]  ;;  %v663_v43 = vld [vmem:[%s2119_s5 + $0x28] sm:$0xff] }
 0x180   :  { %677 = vmatpush.msra.mxu1 %v665_v38 }
 0x181   :  { %v283_v45 = vpop.permute.xlu0 %282  ;;  %531 = vmatmul.bf16.vlgmr.msrb.gmra.mxu2 %v1327_v44 }
 0x182   :  { %v292_v47 = vrot.slane %v283_v45, 4  ;;  %678 = vmatpush.msra.mxu1 %v664_v41 }
 0x183   :  { %v285_v48 = vpop.permute.xlu1 %284  ;;  %v289_v52 = vpop.permute.xlu2 %288 }
 0x184   :  { %v298_v49 = vsel %vm61_vm2, %v292_v47, %v283_v45  ;;  %v293_v50 = vrot.slane %v285_v48, 4  ;;  %v295_v55 = vrot.slane %v289_v52, 4  ;;  %679 = vmatpush.msra.mxu1 %v663_v43  ;;  %v662_v45 = vld [vmem:[%s2119_s5 + $0x20] sm:$0xff]  ;;  %v660_v47 = vld [vmem:[%s2119_s5 + $0x10] sm:$0xff] }
 0x185   :  { %311 = vst.msk [vmem:[#allocation4 + $0x4] sm:$0xff] %vm1795_vm3, %v298_v49  ;;  %v659_v49 = vld [vmem:[%s2119_s5 + $0x8] sm:$0xff] }
 0x186   :  { %v299_v51 = vsel %vm61_vm2, %v293_v50, %v285_v48  ;;  %v301_v61 = vsel %vm61_vm2, %v295_v55, %v289_v52  ;;  %v1338_v12 = vld [vmem:[#allocation4 + $0x18] sm:$0xf]  ;;  %680 = vmatpush.msra.mxu1 %v662_v45  ;;  %v658_v52 = vld [vmem:[%s2119_s5] sm:$0xff] }
 0x187   :  { %312 = vst.msk [vmem:[#allocation4 + $0x10] sm:$0xff] %vm1795_vm3, %v299_v51 }
 0x188   :  { %681 = vmatpush.msra.mxu1 %v661_v46 }
 0x189   :  { %v230_v56 = vpop.permute.xlu0 %229 }
 0x18a   :  { %v236_v57 = vrot.slane %v230_v56, 4  ;;  %682 = vmatpush.msra.mxu1 %v660_v47 }
 0x18b   :  { %v287_v58 = vpop.permute.xlu1 %286 }
 0x18c   :  { %v242_v59 = vsel %vm53_vm1, %v236_v57, %v230_v56  ;;  %v294_v60 = vrot.slane %v287_v58, 4  ;;  %v1503_v62 = vld [vmem:[#allocation4 + $0x4] sm:$0xf]  ;;  %v1334_v63 = vld [vmem:[#allocation4 + $0x8] sm:$0xf]  ;;  %683 = vmatpush.msra.mxu1 %v659_v49  ;;  %v1859_v56 = vpop.permute.xlu2 %594 }
 0x18d   :  { %255 = vst.msk [vmem:[#allocation4 + $0x24] sm:$0xff] %vm1769_vm14, %v242_v59 }
 0x18e   :  { %314 = vst.msk [vmem:[#allocation4 + $0x28] sm:$0xff] %vm1795_vm3, %v301_v61  ;;  %v300_v0 = vsel %vm61_vm2, %v294_v60, %v287_v58  ;;  %v1328_v1 = vld [vmem:[#allocation4 + $0xc] sm:$0xf0]  ;;  %v1505_v2 = vld [vmem:[#allocation4 + $0x10] sm:$0xf0]  ;;  %684 = vmatpush.msra.mxu1 %v658_v52 }
 0x18f   :  { %313 = vst.msk [vmem:[#allocation4 + $0x1c] sm:$0xff] %vm1795_vm3, %v300_v0  ;;  %v1331_v3 = vor.u32 %v1503_v62, %v1328_v1  ;;  %v1335_v4 = vor.u32 %v1505_v2, %v1334_v63 }
 0x190   :  { %701 = vmatpush.msrb.mxu1 %v665_v38 }
 0x191   :  { %v232_v5 = vpop.permute.xlu0 %231  ;;  %554 = vmatmul.bf16.vlgmr.msrb.gmra.mxu3 %v1331_v3  ;;  %1420 = vmatmul.msk.bf16.vlgmr.msra.gmra.mxu0 %vm513_vm4, %v1335_v4 }
 0x192   :  { %v237_v8 = vrot.slane %v232_v5, 4  ;;  %702 = vmatpush.msrb.mxu1 %v664_v41 }
 0x193   :  { %v291_v9 = vpop.permute.xlu1 %290 }
 0x194   :  { %v243_v10 = vsel %vm53_vm1, %v237_v8, %v232_v5  ;;  %v296_v11 = vrot.slane %v291_v9, 4  ;;  %v1507_v13 = vld [vmem:[#allocation4 + $0x20] sm:$0xf0]  ;;  %703 = vmatpush.msrb.mxu1 %v663_v43  ;;  %v1879_v6 = vpop.permute.xlu2 %609  ;;  %vm629_vm1 = vcmask 519168  }
 0x195   :  { %259 = vst.msk [vmem:[#allocation4 + $0x30] sm:$0x33] %vm258_vm10, %v243_v10  ;;  %v1339_v14 = vor.u32 %v1507_v13, %v1338_v12  ;;  %v1340_v18 = vld [vmem:[#allocation4 + $0x24] sm:$0xf0]  ;;  %v1508_v21 = vld [vmem:[#allocation4 + $0x28] sm:$0xf0] }
 0x196   :  { %v302_v15 = vsel %vm61_vm2, %v296_v11, %v291_v9  ;;  %v1506_v19 = vld [vmem:[#allocation4 + $0x1c] sm:$0xf]  ;;  %v1346_v20 = vld [vmem:[#allocation4 + $0x20] sm:$0xf]  ;;  %704 = vmatpush.msrb.mxu1 %v662_v45 }
 0x197   :  { %318 = vst.msk [vmem:[#allocation4 + $0x34] sm:$0x33] %vm317_vm12, %v302_v15  ;;  %536 = vmatmul.bf16.gmra.mxu2 %v1339_v14  ;;  %v1343_v23 = vor.u32 %v1506_v19, %v1340_v18  ;;  %v1347_v24 = vor.u32 %v1508_v21, %v1346_v20 }
 0x198   :  { %705 = vmatpush.msrb.mxu1 %v661_v46 }
 0x199   :  { %v1863_v58 = vpop.permute.xlu0 %599 }
 0x19a   :  { %706 = vmatpush.msrb.mxu1 %v660_v47 }
 0x19b   :  { %v1869_v62 = vpop.permute.xlu1 %604 }
 0x19c   :  { %707 = vmatpush.msrb.mxu1 %v659_v49 }
 0x19e   :  { %v327_v22 = vld [vmem:[#allocation4 + $0x30] sm:$0x33]  ;;  %v328_v27 = vld [vmem:[#allocation4 + $0x38] sm:$0x3]  ;;  %708 = vmatpush.msrb.mxu1 %v658_v52 }
 0x19f   :  { %v387_v25 = vunpack.c.l.b16 %v327_v22  ;;  %v388_v28 = vunpack.c.h.b16 %v327_v22  ;;  %v389_v29 = vunpack.c.l.b16 %v328_v27 }
 0x1a1   :  { %559 = vmatmul.bf16.gmra.mxu3 %v1343_v23  ;;  %1421 = vmatmul.msk.bf16.gmra.mxu0 %vm513_vm4, %v1347_v24  ;;  %v396_v26 = vpack.c.b16 %v387_v25, %v387_v25  ;;  %v397_v30 = vpack.c.b16 %v388_v28, %v388_v28  ;;  %v398_v32 = vpack.c.b16 %v389_v29, %v389_v29 }
 0x1a3   :  { %v1896_v27 = vpop.permute.xlu1 %614 }
 0x1a7   :  { %541 = vmatmul.bf16.gmra.mxu2 %v396_v26 }
 0x1b1   :  { %564 = vmatmul.bf16.gmra.mxu3 %v397_v30  ;;  %1422 = vmatmul.msk.bf16.gmra.mxu0 %vm513_vm4, %v398_v32  ;;  %vm733_vm4 = vcmask 31744  }
 0x204   :  { %v532_v33 = vpop.f32.mrf.mxu2 }
 0x20c   :  { %v534_v35 = vpop.f32.mrf.mxu2 }
 0x20e   :  { %v578_v34 = vpop.f32.mrf.mxu0 }
 0x214   :  { %v555_v36 = vpop.f32.mrf.mxu3 }
 0x215   :  { %v556_v54 = vadd.f32 %v555_v36, %v532_v33 }
 0x216   :  { %v580_v37 = vpop.f32.mrf.mxu0 }
 0x217   :  { %v1865_v60 = vadd.f32 %v578_v34, %v556_v54  ;;  %v732_v54 = vld [vmem:[%s2120_s6] sm:$0xf] }
 0x219   :  { %v617_v3 = vmul.f32 %v1859_v56, %v1865_v60 }
 0x21a   :  { %v537_v40 = vpop.f32.mrf.mxu2 }
 0x21b   :  { %v638_v10 = vmul.f32 %v617_v3, %v1865_v60  ;;  %v622_v13 = vsel %vm61_vm2, %v617_v3, 0.0 }
 0x21c   :  { %v557_v42 = vpop.f32.mrf.mxu3 }
 0x21d   :  { %v558_v51 = vadd.f32 %v557_v42, %v534_v35  ;;  %v643_v21 = vsel %vm61_vm2, %v638_v10, 0.0  ;;  %v716_v10 = vld [vmem:[%s2121_s9] sm:$0x1] }
 0x21e   :  { %v583_v44 = vpop.f32.mrf.mxu0 }
 0x21f   :  { %v1861_v57 = vadd.f32 %v580_v37, %v558_v51 }
 0x221   :  { %v618_v0 = vmul.f32 %v1863_v58, %v1861_v57 }
 0x222   :  { %v539_v48 = vpop.f32.mrf.mxu2 }
 0x223   :  { %v639_v7 = vmul.f32 %v618_v0, %v1861_v57  ;;  %v623_v11 = vsel %vm61_vm2, %v618_v0, 0.0 }
 0x224   :  { %v560_v50 = vpop.f32.mrf.mxu3  ;;  %v624_v19 = vadd.f32 %v623_v11, %v622_v13 }
 0x225   :  { %v561_v55 = vadd.f32 %v560_v50, %v537_v40  ;;  %v644_v15 = vsel %vm61_vm2, %v639_v7, 0.0 }
 0x226   :  { %v585_v53 = vpop.f32.mrf.mxu0  ;;  %v645_v25 = vadd.f32 %v644_v15, %v643_v21  ;;  %v729_v15 = vld [vmem:[%s2122_s10] sm:$0x1] }
 0x227   :  { %v1867_v61 = vadd.f32 %v583_v44, %v561_v55 }
 0x229   :  { %v619_v4 = vmul.f32 %v1869_v62, %v1867_v61 }
 0x22a   :  { %v542_v59 = vpop.f32.mrf.mxu2 }
 0x22b   :  { %v640_v12 = vmul.f32 %v619_v4, %v1867_v61  ;;  %v625_v16 = vsel %vm61_vm2, %v619_v4, 0.0 }
 0x22c   :  { %v562_v63 = vpop.f32.mrf.mxu3  ;;  %v626_v26 = vadd.f32 %v625_v16, %v624_v19  ;;  %v1540_v19 = vld [vmem:[%s2123_s4 + $0x48] sm:$0xff] }
 0x22d   :  { %v563_v1 = vadd.f32 %v562_v63, %v539_v48  ;;  %v646_v22 = vsel %vm61_vm2, %v640_v12, 0.0 }
 0x22e   :  { %v588_v2 = vpop.f32.mrf.mxu0  ;;  %v647_v30 = vadd.f32 %v646_v22, %v645_v25  ;;  %v1539_v22 = vld [vmem:[%s2123_s4 + $0x40] sm:$0xff] }
 0x22f   :  { %v1877_v5 = vadd.f32 %v585_v53, %v563_v1 }
 0x231   :  { %v620_v8 = vmul.f32 %v1879_v6, %v1877_v5 }
 0x232   :  { %v544_v9 = vpop.f32.mrf.mxu2 }
 0x233   :  { %v641_v17 = vmul.f32 %v620_v8, %v1877_v5  ;;  %v627_v23 = vsel %vm61_vm2, %v620_v8, 0.0 }
 0x234   :  { %v565_v14 = vpop.f32.mrf.mxu3  ;;  %v628_v32 = vadd.f32 %v627_v23, %v626_v26 }
 0x235   :  { %v566_v18 = vadd.f32 %v565_v14, %v542_v59  ;;  %v648_v28 = vsel %vm61_vm2, %v641_v17, 0.0  ;;  %v1542_v17 = vld [vmem:[%s2123_s4 + $0x58] sm:$0xff] }
 0x236   :  { %v590_v20 = vpop.f32.mrf.mxu0  ;;  %v649_v35 = vadd.f32 %v648_v28, %v647_v30 }
 0x237   :  { %v1894_v24 = vadd.f32 %v588_v2, %v566_v18  ;;  %v1541_v18 = vld [vmem:[%s2123_s4 + $0x50] sm:$0xff] }
 0x239   :  { %v621_v29 = vmul.f32 %v1896_v27, %v1894_v24 }
 0x23b   :  { %v630_v33 = vsel %vm629_vm1, %v621_v29, 0.0  ;;  %v642_v34 = vmul.f32 %v621_v29, %v1894_v24 }
 0x23c   :  { %v567_v36 = vpop.f32.mrf.mxu3  ;;  %v631_v37 = vadd.f32 %v630_v33, %v628_v32 }
 0x23d   :  { %v650_v38 = vsel %vm629_vm1, %v642_v34, 0.0 }
 0x23e   :  { %v651_v40 = vadd.f32 %v650_v38, %v649_v35  ;;  %v632_v41 = vrot.slane %v631_v37, 4 }
 0x240   :  { %v652_v42 = vrot.slane %v651_v40, 4  ;;  %v633_v43 = vadd.f32 %v632_v41, %v631_v37 }
 0x242   :  { %v634_v44 = vrot.slane %v633_v43, 2  ;;  %v653_v45 = vadd.f32 %v652_v42, %v651_v40 }
 0x244   :  { %v635_v46 = vadd.f32 %v634_v44, %v633_v43  ;;  %v654_v47 = vrot.slane %v653_v45, 2 }
 0x246   :  { %v636_v48 = vrot.slane %v635_v46, 1  ;;  %v655_v50 = vadd.f32 %v654_v47, %v653_v45 }
 0x248   :  { %v637_v49 = vadd.f32 %v636_v48, %v635_v46  ;;  %v656_v51 = vrot.slane %v655_v50, 1 }
 0x24a   :  { %1423 = vmatmul.msk.f32.vlgmr.msra.gmra.mxu1 %vm61_vm2, %v637_v49  ;;  %v657_v52 = vadd.f32 %v656_v51, %v655_v50 }
 0x24b   :  { %1425 = vmatpush.msk.msra.mxu1 %vm737_vm13, %v732_v54 }
 0x252   :  { %1424 = vmatmul.msk.f32.vlgmr.msrb.gmra.mxu1 %vm61_vm2, %v657_v52 }
 0x253   :  { %1427 = vmatpush.msk.msrb.mxu1 %vm737_vm13, %v732_v54 }
 0x2c7   :  { %v686_v53 = vpop.f32.mrf.mxu1 }
 0x2c8   :  { %v689_v55 = vmul.f32 0.001953125, %v686_v53 }
 0x2ca   :  { %v714_v63 = vmul.f32 %v689_v55, %v689_v55 }
 0x2cf   :  { %v710_v59 = vpop.f32.mrf.mxu1 }
 0x2d0   :  { %v713_v0 = vmul.f32 0.001953125, %v710_v59 }
 0x2d2   :  { %v715_v1 = vsub.f32 %v713_v0, %v714_v63 }
 0x2d4   :  { %v717_v2 = vadd.f32 1e-05, %v715_v1 }
 0x2d6   :  { %1550 = vrsqrt.f32 %v717_v2  ;;  %vm724_vm0 = vweird.f32 %v717_v2 }
 0x2dc   :  { %v1551_v3 = vpop.eup %1550 }
 0x2dd   :  { %v719_v4 = vmul.f32 %v1551_v3, %v717_v2  ;;  %vm725_vm14 = vweird.f32 %v1551_v3 }
 0x2de   :  { %vm726_vm3 = vmor %vm724_vm0, %vm725_vm14 }
 0x2df   :  { %v720_v7 = vmul.f32 %v1551_v3, %v719_v4 }
 0x2e1   :  { %v721_v8 = vmul.f32 0.5, %v720_v7 }
 0x2e3   :  { %v722_v9 = vsub.f32 1.5, %v721_v8 }
 0x2e5   :  { %v723_v11 = vmul.f32 %v1551_v3, %v722_v9 }
 0x2e7   :  { %v727_v12 = vsel %vm726_vm3, %v1551_v3, %v723_v11 }
 0x2e8   :  { %v728_v13 = vmul.f32 %v727_v12, %v716_v10 }
 0x2ea   :  { %1426 = vmatmul.msk.f32.vlgmr.msra.gmra.mxu1 %vm733_vm4, %v728_v13  ;;  %v730_v14 = vmul.f32 %v728_v13, %v689_v55 }
 0x2eb   :  { %1091 = vmatpush.bf16.msra.mxu1 %v1542_v17 }
 0x2ec   :  { %v731_v16 = vsub.f32 %v729_v15, %v730_v14  ;;  %v1538_v15 = vld [vmem:[%s2123_s4 + $0x38] sm:$0xff] }
 0x2ed   :  { %1064 = vmatpush.bf16.msrb.mxu0 %v1538_v15 }
 0x2ef   :  { %1092 = vmatpush.bf16.msra.mxu1 %v1541_v18 }
 0x2f2   :  { %1428 = vmatmul.msk.f32.vlgmr.msrb.gmra.mxu1 %vm733_vm4, %v731_v16 }
 0x2f3   :  { %1093 = vmatpush.bf16.msra.mxu1 %v1540_v19 }
 0x2f7   :  { %1094 = vmatpush.bf16.msra.mxu1 %v1539_v22  ;;  %v1537_v22 = vld [vmem:[%s2123_s4 + $0x30] sm:$0xff] }
 0x2f8   :  { %1065 = vmatpush.bf16.msrb.mxu0 %v1537_v22  ;;  %v1154_v22 = vld [vmem:[%s2124_s7 + $0x20] sm:$0xff] }
 0x367   :  { %v758_v20 = vpop.f32.mrf.mxu1 }
 0x368   :  { %v784_v21 = vperm.slane %v758_v20, 0 }
 0x36a   :  { %v785_v23 = vmul.f32 %v784_v21, %v1865_v60  ;;  %v786_v26 = vmul.f32 %v784_v21, %v1861_v57  ;;  %v787_v28 = vmul.f32 %v784_v21, %v1867_v61  ;;  %v788_v29 = vmul.f32 %v784_v21, %v1877_v5 }
 0x36b   :  { %v789_v32 = vmul.f32 %v784_v21, %v1894_v24 }
 0x36f   :  { %v781_v25 = vpop.f32.mrf.mxu1 }
 0x370   :  { %v790_v30 = vperm.slane %v781_v25, 0 }
 0x372   :  { %v791_v33 = vadd.f32 %v790_v30, %v785_v23  ;;  %v792_v34 = vadd.f32 %v790_v30, %v786_v26  ;;  %v793_v35 = vadd.f32 %v790_v30, %v787_v28  ;;  %v794_v36 = vadd.f32 %v790_v30, %v788_v29 }
 0x373   :  { %v795_v37 = vadd.f32 %v790_v30, %v789_v32 }
 0x374   :  { %v796_v38 = vmax.f32 %v791_v33, 0.0  ;;  %v797_v40 = vmax.f32 %v792_v34, 0.0  ;;  %v798_v41 = vmax.f32 %v793_v35, 0.0  ;;  %v799_v60 = vmax.f32 %v794_v36, 0.0 }
 0x375   :  { %v800_v42 = vmax.f32 %v795_v37, 0.0 }
 0x376   :  { %v801_v57 = vmul.f32 %v796_v38, %v1859_v56  ;;  %v802_v61 = vmul.f32 %v797_v40, %v1863_v58  ;;  %v803_v5 = vmul.f32 %v798_v41, %v1869_v62  ;;  %v804_v43 = vmul.f32 %v799_v60, %v1879_v6  ;;  %v1536_v41 = vld [vmem:[%s2123_s4 + $0x28] sm:$0xff] }
 0x377   :  { %v805_v24 = vmul.f32 %v800_v42, %v1896_v27  ;;  %1066 = vmatpush.bf16.msrb.mxu0 %v1536_v41 }
 0x378   :  { %811 = vst.msk [vmem:[#allocation3 + $0x1] sm:$0xff] %vm61_vm2, %v801_v57 }
 0x379   :  { %812 = vst.msk [vmem:[#allocation3 + $0x9] sm:$0xff] %vm61_vm2, %v802_v61 }
 0x37a   :  { %813 = vst.msk [vmem:[#allocation3 + $0x11] sm:$0xff] %vm61_vm2, %v803_v5 }
 0x37b   :  { %814 = vst.msk [vmem:[#allocation3 + $0x19] sm:$0xff] %vm61_vm2, %v804_v43 }
 0x37c   :  { %815 = vst.msk [vmem:[#allocation3 + $0x21] sm:$0xf] %vm629_vm1, %v805_v24 }
 0x37f   :  { %v816_v44 = vld [vmem:[#allocation3] sm:$0xff] }
 0x380   :  { %v817_v45 = vld [vmem:[#allocation3 + $0x8] sm:$0xff]  ;;  %v821_v46 = vpack.c.bf16 %v816_v44, %v816_v44 }
 0x381   :  { %v818_v47 = vld [vmem:[#allocation3 + $0x10] sm:$0xff]  ;;  %v822_v48 = vpack.c.bf16 %v817_v45, %v817_v45 }
 0x382   :  { %v819_v49 = vld [vmem:[#allocation3 + $0x18] sm:$0xff]  ;;  %v823_v50 = vpack.c.bf16 %v818_v47, %v818_v47  ;;  %v833_v51 = vshrl.u32 %v821_v46, 16  ;;  %v836_v52 = vshll.u32 %v821_v46, 16  ;;  %v1429_v53 = vrot.slane %v821_v46, 9  ;;  %826 = vst.msk [vmem:[#allocation5] sm:$0xf] %vm629_vm1, %v821_v46 }
 0x383   :  { %v824_v54 = vpack.c.bf16 %v819_v49, %v819_v49  ;;  %v842_v55 = vshll.u32 %v822_v48, 16  ;;  %v846_v59 = vshrl.u32 %v822_v48, 16  ;;  %v908_v63 = vrot.slane %v822_v48, 5  ;;  %827 = vst.msk [vmem:[#allocation5 + $0x8] sm:$0xf] %vm629_vm1, %v822_v48  ;;  %v820_v14 = vld [vmem:[#allocation3 + $0x20] sm:$0xff] }
 0x384   :  { %v852_v0 = vshll.u32 %v823_v50, 16  ;;  %v856_v1 = vshrl.u32 %v823_v50, 16  ;;  %v911_v2 = vrot.slane %v823_v50, 5  ;;  %828 = vst.msk [vmem:[#allocation5 + $0x10] sm:$0xf] %vm629_vm1, %v823_v50  ;;  %v835_v3 = vrot.slane %v833_v51, 4 }
 0x385   :  { %v862_v4 = vshll.u32 %v824_v54, 16  ;;  %v914_v7 = vrot.slane %v824_v54, 5  ;;  %829 = vst.msk [vmem:[#allocation5 + $0x18] sm:$0xf] %vm629_vm1, %v824_v54  ;;  %v844_v8 = vrot.slane %v842_v55, 5  ;;  %v848_v9 = vrot.slane %v846_v59, 4 }
 0x386   :  { %v854_v10 = vrot.slane %v852_v0, 5  ;;  %v858_v11 = vrot.slane %v856_v1, 4  ;;  %v913_v12 = vrot.slane %v911_v2, 4  ;;  %v910_v13 = vrot.slane %v908_v63, 4  ;;  %v1531_v55 = vld [vmem:[%s2123_s4] sm:$0xff] }
 0x387   :  { %v849_v16 = vor.u32 %v848_v9, %v844_v8  ;;  %v838_v17 = vrot.slane %v836_v52, 5  ;;  %v909_v21 = vsel %vm1679_vm9, %v1429_v53, %v908_v63  ;;  %v825_v26 = vpack.c.bf16 %v820_v14, %v820_v14  ;;  %v1535_v52 = vld [vmem:[%s2123_s4 + $0x20] sm:$0xff]  ;;  %v1534_v53 = vld [vmem:[%s2123_s4 + $0x18] sm:$0xff] }
 0x388   :  { %v859_v18 = vor.u32 %v858_v11, %v854_v10  ;;  %v915_v19 = vsel %vm1679_vm9, %v913_v12, %v914_v7  ;;  %v912_v20 = vsel %vm1679_vm9, %v910_v13, %v911_v2  ;;  %v866_v28 = vshrl.u32 %v824_v54, 16  ;;  %925 = vst.msk [vmem:[#allocation5 + $0x4] sm:$0xf] %vm629_vm1, %v909_v21  ;;  %1067 = vmatpush.bf16.msrb.mxu0 %v1535_v52  ;;  %v1532_v54 = vld [vmem:[%s2123_s4 + $0x8] sm:$0xff] }
 0x389   :  { %927 = vst.msk [vmem:[#allocation5 + $0x14] sm:$0xf] %vm629_vm1, %v915_v19  ;;  %v850_v23 = vrot.slane %v849_v16, 4  ;;  %v839_v25 = vor.u32 %v838_v17, %v835_v3  ;;  %v864_v30 = vrot.slane %v862_v4, 5  ;;  %v916_v32 = vrot.slane %v914_v7, 4  ;;  %v1157_v17 = vld [vmem:[%s2124_s7 + $0x38] sm:$0xff] }
 0x38a   :  { %v860_v29 = vrot.slane %v859_v18, 4  ;;  %926 = vst.msk [vmem:[#allocation5 + $0xc] sm:$0xf] %vm629_vm1, %v912_v20  ;;  %v872_v35 = vshll.u32 %v825_v26, 16  ;;  %v876_v36 = vshrl.u32 %v825_v26, 16  ;;  %v917_v38 = vrot.slane %v825_v26, 5  ;;  %1169 = vmatpush.msra.mxu2 %v1157_v17  ;;  %1193 = vmatpush.msra.mxu3 %v1157_v17 }
 0x38b   :  { %v855_v33 = vsel %vm1692_vm11, %v850_v23, %v854_v10  ;;  %v840_v34 = vrot.slane %v839_v25, 4  ;;  %v868_v40 = vrot.slane %v866_v28, 4  ;;  %831 = vst.msk [vmem:[#allocation5 + $0x20] sm:$0x3] %vm830_vm5, %v825_v26  ;;  %v1156_v19 = vld [vmem:[%s2124_s7 + $0x30] sm:$0xff]  ;;  %v1155_v21 = vld [vmem:[%s2124_s7 + $0x28] sm:$0xff] }
 0x38c   :  { %v865_v37 = vsel %vm1692_vm11, %v860_v29, %v864_v30  ;;  %883 = vrot.lane.b32.xlu0 %v855_v33, %s1555_s0  ;;  %v874_v42 = vrot.slane %v872_v35, 5  ;;  %v878_v57 = vrot.slane %v876_v36, 4  ;;  %v918_v61 = vsel %vm1679_vm9, %v916_v32, %v917_v38  ;;  %1068 = vmatpush.bf16.msrb.mxu0 %v1534_v53  ;;  %v1153_v25 = vld [vmem:[%s2124_s7 + $0x18] sm:$0xff]  ;;  %v1152_v32 = vld [vmem:[%s2124_s7 + $0x10] sm:$0xff]  ;;  %v1151_v33 = vld [vmem:[%s2124_s7 + $0x8] sm:$0xff] }
 0x38d   :  { %885 = vrot.lane.b32.xlu1 %v865_v37, %s1555_s0  ;;  %v845_v60 = vsel %vm1692_vm11, %v840_v34, %v844_v8  ;;  %v869_v5 = vor.u32 %v868_v40, %v864_v30  ;;  %v919_v43 = vrot.slane %v917_v38, 4  ;;  %928 = vst.msk [vmem:[#allocation5 + $0x1c] sm:$0xf] %vm629_vm1, %v918_v61  ;;  %1170 = vmatpush.msra.mxu2 %v1156_v19  ;;  %v1150_v35 = vld [vmem:[%s2124_s7] sm:$0xff] }
 0x38e   :  { %881 = vrot.lane.b32.xlu2 %v845_v60, %s1555_s0  ;;  %v879_v24 = vor.u32 %v878_v57, %v874_v42  ;;  %1194 = vmatpush.msra.mxu3 %v1156_v19 }
 0x38f   :  { %929 = vst.msk [vmem:[#allocation5 + $0x24] sm:$0x3] %vm830_vm5, %v919_v43  ;;  %v870_v45 = vrot.slane %v869_v5, 4  ;;  %v1527_v46 = vld [vmem:[#allocation5 + $0x4] sm:$0xf]  ;;  %1171 = vmatpush.msra.mxu2 %v1155_v21 }
 0x390   :  { %v880_v47 = vrot.slane %v879_v24, 4  ;;  %v1529_v49 = vld [vmem:[#allocation5 + $0x14] sm:$0xf]  ;;  %1069 = vmatpush.bf16.msrb.mxu0 %v1533_v39  ;;  %1195 = vmatpush.msra.mxu3 %v1155_v21 }
 0x391   :  { %v1434_v44 = vld [vmem:[#allocation5 + $0x8] sm:$0xf0]  ;;  %v875_v31 = vsel %vm1692_vm11, %v870_v45, %v874_v42  ;;  %1172 = vmatpush.msra.mxu2 %v1154_v22 }
 0x392   :  { %v1437_v48 = vor.u32 %v1527_v46, %v1434_v44  ;;  %1196 = vmatpush.msra.mxu3 %v1154_v22  ;;  %v1224_v22 = vld [vmem:[%s2125_s8] sm:$0xf] }
 0x393   :  { %1173 = vmatpush.msra.mxu2 %v1153_v25 }
 0x394   :  { %889 = vrot.lane.b32.xlu0 %v880_v47, %s1555_s0  ;;  %1494 = vmatmul.msk.bf16.vlgmr.msra.gmra.mxu1 %vm61_vm2, %v1437_v48  ;;  %v1442_v50 = vld [vmem:[#allocation5 + $0x18] sm:$0xf0] }
 0x395   :  { %v1445_v51 = vor.u32 %v1529_v49, %v1442_v50  ;;  %1070 = vmatpush.bf16.msrb.mxu0 %v1532_v54  ;;  %1197 = vmatpush.msra.mxu3 %v1153_v25 }
 0x396   :  { %887 = vrot.lane.b32.xlu2 %v875_v31, %s1555_s0  ;;  %1174 = vmatpush.msra.mxu2 %v1152_v32 }
 0x397   :  { %1198 = vmatpush.msra.mxu3 %v1152_v32 }
 0x398   :  { %1175 = vmatpush.msra.mxu2 %v1151_v33 }
 0x399   :  { %1071 = vmatpush.bf16.msrb.mxu0 %v1531_v55  ;;  %1199 = vmatpush.msra.mxu3 %v1151_v33 }
 0x39a   :  { %1176 = vmatpush.msra.mxu2 %v1150_v35 }
 0x39b   :  { %1200 = vmatpush.msra.mxu3 %v1150_v35 }
 0x39c   :  { %1499 = vmatpush.msk.msrb.mxu2 %vm737_vm13, %v1224_v22 }
 0x39d   :  { %1501 = vmatpush.msk.msrb.mxu3 %vm737_vm13, %v1224_v22 }
 0x3a4   :  { %1495 = vmatmul.msk.bf16.gmra.mxu1 %vm61_vm2, %v1445_v51 }
 0x3e8   :  { %v882_v59 = vpop.permute.xlu2 %881 }
 0x3e9   :  { %896 = vst.msk [vmem:[#allocation5] sm:$0xf] %vm308_vm15, %v882_v59 }
 0x3f0   :  { %v888_v63 = vpop.permute.xlu2 %887  ;;  %v1432_v3 = vld [vmem:[#allocation5] sm:$0xf] }
 0x3f1   :  { %899 = vst.msk [vmem:[#allocation5 + $0x18] sm:$0xf] %vm308_vm15, %v888_v63 }
 0x3f8   :  { %v1530_v12 = vld [vmem:[#allocation5 + $0x14] sm:$0xf0] }
 0x3fe   :  { %v884_v0 = vpop.permute.xlu0 %883 }
 0x3ff   :  { %v886_v1 = vpop.permute.xlu1 %885  ;;  %897 = vst.msk [vmem:[#allocation5 + $0x8] sm:$0xf] %vm308_vm15, %v884_v0 }
 0x400   :  { %898 = vst.msk [vmem:[#allocation5 + $0x10] sm:$0xf] %vm308_vm15, %v886_v1 }
 0x406   :  { %v890_v2 = vpop.permute.xlu0 %889  ;;  %v1528_v4 = vld [vmem:[#allocation5 + $0x4] sm:$0xf0] }
 0x407   :  { %900 = vst.msk [vmem:[#allocation5 + $0x20] sm:$0x3] %vm315_vm7, %v890_v2  ;;  %v1433_v7 = vor.u32 %v1528_v4, %v1432_v3  ;;  %v1440_v11 = vld [vmem:[#allocation5 + $0x10] sm:$0xf] }
 0x408   :  { %v1441_v13 = vor.u32 %v1530_v12, %v1440_v11 }
 0x409   :  { %1072 = vmatmul.bf16.vlgmr.msrb.gmra.mxu0 %v1433_v7 }
 0x40e   :  { %v934_v8 = vld [vmem:[#allocation5 + $0x20] sm:$0x33] }
 0x40f   :  { %v973_v9 = vunpack.c.h.b16 %v934_v8  ;;  %v972_v14 = vunpack.c.l.b16 %v934_v8 }
 0x411   :  { %v979_v10 = vpack.c.b16 %v973_v9, %v973_v9  ;;  %v978_v15 = vpack.c.b16 %v972_v14, %v972_v14  ;;  %v1096_v16 = vpop.f32.mrf.mxu1 }
 0x413   :  { %1496 = vmatmul.msk.bf16.gmra.mxu1 %vm61_vm2, %v979_v10 }
 0x419   :  { %1077 = vmatmul.bf16.gmra.mxu0 %v1441_v13  ;;  %v1098_v18 = vpop.f32.mrf.mxu1 }
 0x421   :  { %v1101_v20 = vpop.f32.mrf.mxu1 }
 0x429   :  { %1082 = vmatmul.bf16.gmra.mxu0 %v978_v15  ;;  %v1103_v26 = vpop.f32.mrf.mxu1 }
 0x486   :  { %v1073_v23 = vpop.f32.mrf.mxu0 }
 0x487   :  { %v2035_v37 = vadd.f32 %v1096_v16, %v1073_v23 }
 0x489   :  { %v1110_v60 = vmul.f32 %v2035_v37, %v1859_v56 }
 0x48b   :  { %v1130_v43 = vmul.f32 %v1110_v60, %v2035_v37  ;;  %v1115_v45 = vsel %vm61_vm2, %v1110_v60, 0.0  ;;  %v1208_v60 = vld [vmem:[%s2126_s11] sm:$0x1] }
 0x48d   :  { %v1135_v50 = vsel %vm61_vm2, %v1130_v43, 0.0  ;;  %v1221_v43 = vld [vmem:[%s2127_s12] sm:$0x1] }
 0x48e   :  { %v1075_v28 = vpop.f32.mrf.mxu0 }
 0x48f   :  { %v2033_v36 = vadd.f32 %v1098_v18, %v1075_v28 }
 0x490   :  { %v1106_v29 = vpop.f32.mrf.mxu1 }
 0x491   :  { %v1111_v40 = vmul.f32 %v2033_v36, %v1863_v58 }
 0x493   :  { %v1131_v61 = vmul.f32 %v1111_v40, %v2033_v36  ;;  %v1116_v24 = vsel %vm61_vm2, %v1111_v40, 0.0 }
 0x494   :  { %v1117_v31 = vadd.f32 %v1116_v24, %v1115_v45 }
 0x495   :  { %v1136_v46 = vsel %vm61_vm2, %v1131_v61, 0.0 }
 0x496   :  { %v1078_v30 = vpop.f32.mrf.mxu0  ;;  %v1137_v39 = vadd.f32 %v1136_v46, %v1135_v50 }
 0x497   :  { %v2037_v38 = vadd.f32 %v1101_v20, %v1078_v30 }
 0x498   :  { %v1108_v34 = vpop.f32.mrf.mxu1 }
 0x499   :  { %v1112_v42 = vmul.f32 %v2037_v38, %v1869_v62 }
 0x49b   :  { %v1132_v44 = vmul.f32 %v1112_v42, %v2037_v38  ;;  %v1118_v47 = vsel %vm61_vm2, %v1112_v42, 0.0 }
 0x49c   :  { %v1119_v54 = vadd.f32 %v1118_v47, %v1117_v31 }
 0x49d   :  { %v1138_v51 = vsel %vm61_vm2, %v1132_v44, 0.0 }
 0x49e   :  { %v1080_v41 = vpop.f32.mrf.mxu0  ;;  %v1139_v63 = vadd.f32 %v1138_v51, %v1137_v39 }
 0x49f   :  { %v2045_v57 = vadd.f32 %v1103_v26, %v1080_v41 }
 0x4a1   :  { %v1113_v5 = vmul.f32 %v2045_v57, %v1879_v6 }
 0x4a3   :  { %v1133_v48 = vmul.f32 %v1113_v5, %v2045_v57  ;;  %v1120_v52 = vsel %vm61_vm2, %v1113_v5, 0.0 }
 0x4a4   :  { %v1121_v0 = vadd.f32 %v1120_v52, %v1119_v54 }
 0x4a5   :  { %v1140_v55 = vsel %vm61_vm2, %v1133_v48, 0.0 }
 0x4a6   :  { %v1083_v49 = vpop.f32.mrf.mxu0  ;;  %v1141_v3 = vadd.f32 %v1140_v55, %v1139_v63 }
 0x4a7   :  { %v2060_v53 = vadd.f32 %v1106_v29, %v1083_v49 }
 0x4a9   :  { %v1114_v59 = vmul.f32 %v2060_v53, %v1896_v27 }
 0x4ab   :  { %v1122_v1 = vsel %vm629_vm1, %v1114_v59, 0.0  ;;  %v1134_v2 = vmul.f32 %v1114_v59, %v2060_v53 }
 0x4ac   :  { %v1123_v4 = vadd.f32 %v1122_v1, %v1121_v0 }
 0x4ad   :  { %v1142_v7 = vsel %vm629_vm1, %v1134_v2, 0.0 }
 0x4ae   :  { %v1124_v8 = vrot.slane %v1123_v4, 4  ;;  %v1143_v9 = vadd.f32 %v1142_v7, %v1141_v3  ;;  %v1085_v10 = vpop.f32.mrf.mxu0 }
 0x4b0   :  { %v1125_v11 = vadd.f32 %v1124_v8, %v1123_v4  ;;  %v1144_v12 = vrot.slane %v1143_v9, 4 }
 0x4b2   :  { %v1126_v13 = vrot.slane %v1125_v11, 2  ;;  %v1145_v14 = vadd.f32 %v1144_v12, %v1143_v9 }
 0x4b4   :  { %v1127_v15 = vadd.f32 %v1126_v13, %v1125_v11  ;;  %v1146_v16 = vrot.slane %v1145_v14, 2 }
 0x4b6   :  { %v1147_v17 = vadd.f32 %v1146_v16, %v1145_v14  ;;  %v1128_v18 = vrot.slane %v1127_v15, 1 }
 0x4b8   :  { %v1129_v19 = vadd.f32 %v1128_v18, %v1127_v15  ;;  %v1148_v20 = vrot.slane %v1147_v17, 1 }
 0x4ba   :  { %1497 = vmatmul.msk.f32.vlgmr.msra.gmra.mxu2 %vm61_vm2, %v1129_v19  ;;  %v1149_v21 = vadd.f32 %v1148_v20, %v1147_v17 }
 0x4bc   :  { %1498 = vmatmul.msk.f32.vlgmr.msra.gmra.mxu3 %vm61_vm2, %v1149_v21 }
 0x53d   :  { %v1178_v23 = vpop.f32.mrf.mxu2 }
 0x53e   :  { %v1181_v25 = vmul.f32 0.001953125, %v1178_v23 }
 0x53f   :  { %v1202_v26 = vpop.f32.mrf.mxu3 }
 0x540   :  { %v1206_v28 = vmul.f32 %v1181_v25, %v1181_v25  ;;  %v1205_v29 = vmul.f32 0.001953125, %v1202_v26 }
 0x542   :  { %v1207_v30 = vsub.f32 %v1205_v29, %v1206_v28 }
 0x544   :  { %v1209_v32 = vadd.f32 1e-05, %v1207_v30 }
 0x546   :  { %1552 = vrsqrt.f32 %v1209_v32  ;;  %vm1216_vm11 = vweird.f32 %v1209_v32 }
 0x54c   :  { %v1553_v33 = vpop.eup %1552 }
 0x54d   :  { %v1211_v34 = vmul.f32 %v1553_v33, %v1209_v32  ;;  %vm1217_vm9 = vweird.f32 %v1553_v33 }
 0x54e   :  { %vm1218_vm15 = vmor %vm1216_vm11, %vm1217_vm9 }
 0x54f   :  { %v1212_v35 = vmul.f32 %v1553_v33, %v1211_v34 }
 0x551   :  { %v1213_v40 = vmul.f32 0.5, %v1212_v35 }
 0x553   :  { %v1214_v41 = vsub.f32 1.5, %v1213_v40 }
 0x555   :  { %v1215_v42 = vmul.f32 %v1553_v33, %v1214_v41 }
 0x557   :  { %v1219_v61 = vsel %vm1218_vm15, %v1553_v33, %v1215_v42 }
 0x558   :  { %v1220_v5 = vmul.f32 %v1219_v61, %v1208_v60 }
 0x55a   :  { %v1222_v24 = vmul.f32 %v1220_v5, %v1181_v25  ;;  %1500 = vmatmul.msk.f32.vlgmr.msrb.gmra.mxu2 %vm733_vm4, %v1220_v5 }
 0x55c   :  { %v1223_v44 = vsub.f32 %v1221_v43, %v1222_v24 }
 0x55e   :  { %1502 = vmatmul.msk.f32.vlgmr.msrb.gmra.mxu3 %vm733_vm4, %v1223_v44 }
 0x5dd   :  { %v1248_v45 = vpop.f32.mrf.mxu2 }
 0x5de   :  { %v1274_v46 = vperm.slane %v1248_v45, 0 }
 0x5e0   :  { %v1275_v47 = vmul.f32 %v1274_v46, %v2035_v37  ;;  %v1276_v31 = vmul.f32 %v1274_v46, %v2033_v36  ;;  %v1279_v50 = vmul.f32 %v1274_v46, %v2060_v53  ;;  %v1278_v51 = vmul.f32 %v1274_v46, %v2045_v57 }
 0x5e1   :  { %v1271_v48 = vpop.f32.mrf.mxu3  ;;  %v1277_v52 = vmul.f32 %v1274_v46, %v2037_v38 }
 0x5e2   :  { %v1280_v49 = vperm.slane %v1271_v48, 0 }
 0x5e4   :  { %v1281_v39 = vadd.f32 %v1280_v49, %v1275_v47  ;;  %v1282_v54 = vadd.f32 %v1280_v49, %v1276_v31  ;;  %v1285_v55 = vadd.f32 %v1280_v49, %v1279_v50  ;;  %v1284_v59 = vadd.f32 %v1280_v49, %v1278_v51 }
 0x5e5   :  { %v1283_v63 = vadd.f32 %v1280_v49, %v1277_v52 }
 0x5e6   :  { %v1286_v0 = vmax.f32 %v1281_v39, 0.0  ;;  %v1287_v1 = vmax.f32 %v1282_v54, 0.0  ;;  %v1290_v2 = vmax.f32 %v1285_v55, 0.0  ;;  %v1289_v3 = vmax.f32 %v1284_v59, 0.0 }
 0x5e7   :  { %v1288_v37 = vmax.f32 %v1283_v63, 0.0 }
 0x5e8   :  { %v1291_v4 = vmul.f32 %v1286_v0, %v1859_v56  ;;  %v1292_v36 = vmul.f32 %v1287_v1, %v1863_v58  ;;  %v1295_v53 = vmul.f32 %v1290_v2, %v1896_v27  ;;  %v1294_v57 = vmul.f32 %v1289_v3, %v1879_v6 }
 0x5e9   :  { %v1293_v38 = vmul.f32 %v1288_v37, %v1869_v62 }
 0x5ea   :  { %1305 = vrot.lane.b32.xlu0 %v1295_v53, %s1555_s0  ;;  %1303 = vrot.lane.b32.xlu2 %v1294_v57, %s1555_s0  ;;  %1296 = vst.msk [vmem:[%s2128_s14] sm:$0xff] %vm61_vm2, %v1291_v4 }
 0x5eb   :  { %1301 = vrot.lane.b32.xlu1 %v1293_v38, %s1555_s0  ;;  %1297 = vst.msk [vmem:[%s2128_s14 + $0x8] sm:$0xff] %vm61_vm2, %v1292_v36 }
 0x644   :  { %v1304_v56 = vpop.permute.xlu2 %1303 }
 0x645   :  { %1313 = vst.msk [vmem:[%s2128_s14 + $0x6] sm:$0xff] %vm1312_vm6, %v1304_v56 }
 0x65c   :  { %v1306_v58 = vpop.permute.xlu0 %1305 }
 0x65d   :  { %1314 = vst.msk [vmem:[%s2128_s14 + $0xe] sm:$0x3] %vm315_vm7, %v1306_v58  ;;  %v1302_v62 = vpop.permute.xlu1 %1301 }
 0x65e   :  { %1311 = vst.msk [vmem:[%s2128_s14 - $0x2] sm:$0xfc] %vm1310_vm8, %v1302_v62 }

</bundles_post_ra>
